<compile_context>
chip_gen: v5e
topology: v5e:2x2
jax: 0.10.0
libtpu: 0.0.40
codegen_flags: <defaults>
</compile_context>

<pallas_src>
import functools

import jax
import jax.numpy as jnp
from jax.experimental import pallas as pl
from jax.experimental.pallas import tpu as pltpu

KSIZE = 7
PAD = (KSIZE - 1) // 2
BN_EPS = 1e-5

# --- chip-aware VMEM budgeting ------------------------------------------------
_DEF_VMEM_CAP = 64 << 20          # conservative (v7x per-core physical VMEM)
try:
    _VMEM_CAP = int(pltpu.get_tpu_info().vmem_capacity_bytes)
except Exception:                  # no TPU visible at import / API mismatch
    _VMEM_CAP = _DEF_VMEM_CAP
# Scoped VMEM limit requested from the compiler: 32 MiB on v7x (64 MiB phys),
# 64 MiB on v5e/v6e (128 MiB phys); never below 16 MiB.
_VMEM_LIMIT = int(max(min(_VMEM_CAP // 2, 64 << 20), 16 << 20))


def _ext_pad(W):
    """Lane-aligned zero-extension length covering the max conv shift (3*W+3)."""
    return ((PAD * W + PAD) + 127) // 128 * 128


def _pick_c_tile(C, HW, itemsize, budget_bytes):
    """Channel tile: full C if it fits (or C<=8), else a multiple of 8 that
    keeps one (c_tile, HW) block within budget_bytes (cdiv grid + masking
    handles a non-dividing last tile)."""
    if C * HW * itemsize <= budget_bytes or C <= 8:
        return C
    per_ch = max(1, HW * itemsize)
    t = max(8, (budget_bytes // per_ch) // 8 * 8)
    if t >= C:
        return C
    return t


def _conv_bn_sig(mx_f32, mean_f32, wcol, w_ref, bn_ref, emx, emn, H, W):
    """7x7 conv (2ch -> 1, zero pad 3) + folded BN + sigmoid on the pooled map.

    Everything stays in the flat lane-dense (1, H*W) domain:
      * the pooled maps are written once (lane-aligned) into zero-extended
        scratch rows `emx`/`emn` of length H*W + 2*_ext_pad(W);
      * tap (kh, kw) is the static flat-shifted slice by (kh-3)*W + (kw-3);
      * a per-tap column mask (wcol = flat index mod W, precomputed in XLA)
        zeroes horizontal taps that would bleed across row boundaries;
        vertical out-of-range taps land in the zero extension.
    Returns the (1, H*W) f32 sigmoid gate.
    """
    HW = H * W
    ep = _ext_pad(W)

    emx[...] = jnp.zeros_like(emx)
    emn[...] = jnp.zeros_like(emn)
    emx[0:1, ep:ep + HW] = mx_f32            # lane-aligned store (ep % 128 == 0)
    emn[0:1, ep:ep + HW] = mean_f32

    # Per-horizontal-offset column masks (dw == 0 needs none).
    masks = []
    for kw in range(KSIZE):
        dw = kw - PAD
        if dw == 0:
            masks.append(None)
        else:
            masks.append((wcol >= -dw) & (wcol < W - dw))

    acc = jnp.zeros((1, HW), jnp.float32)
    for c, src in ((0, emx), (1, emn)):
        for kh in range(KSIZE):
            for kw in range(KSIZE):
                wv = w_ref[c * KSIZE * KSIZE + kh * KSIZE + kw]
                start = ep + (kh - PAD) * W + (kw - PAD)
                term = src[0:1, start:start + HW]
                m = masks[kw]
                if m is not None:
                    term = jnp.where(m, term, 0.0)
                acc = acc + wv * term

    z = acc * bn_ref[0] + bn_ref[1]
    return jax.nn.sigmoid(z)


# --- fused single-pass kernel (primary path) ----------------------------------
def _fused_kernel(w_ref, bn_ref, col_ref, x_ref, o_ref, emx, emn, *, C, H, W):
    # Channel pooling: max in native dtype, mean accumulated in f32.
    mx = jnp.max(x_ref[...], axis=0, keepdims=True).astype(jnp.float32)
    mean = jnp.sum(x_ref[...], axis=0, keepdims=True,
                   dtype=jnp.float32) * (1.0 / C)
    s = _conv_bn_sig(mx, mean, col_ref[...], w_ref, bn_ref, emx, emn, H, W)
    x = x_ref[...]
    o_ref[...] = x * s.astype(x.dtype)        # lane-dense (C, HW) store


# --- fallback pass 1: tiled channel pooling + conv/BN/sigmoid epilogue --------
def _pool_conv_kernel(w_ref, bn_ref, col_ref, x_ref, scale_ref,
                      mx_s, sum_s, emx, emn, *, C, c_tile, H, W, mask_last):
    ci = pl.program_id(1)
    x = x_ref[...]                                          # (c_tile, HW)
    if mask_last:
        ch = ci * c_tile + jax.lax.broadcasted_iota(jnp.int32, (c_tile, 1), 0)
        valid = ch < C
        xm = jnp.where(valid, x, jnp.asarray(-jnp.inf, x.dtype))
        xs = jnp.where(valid, x, jnp.zeros((), x.dtype))
    else:
        xm = x
        xs = x
    tmax = jnp.max(xm, axis=0, keepdims=True)               # native dtype
    tsum = jnp.sum(xs, axis=0, keepdims=True, dtype=jnp.float32)

    @pl.when(ci == 0)
    def _():
        mx_s[...] = tmax
        sum_s[...] = tsum

    @pl.when(ci > 0)
    def _():
        mx_s[...] = jnp.maximum(mx_s[...], tmax)
        sum_s[...] = sum_s[...] + tsum

    @pl.when(ci == pl.num_programs(1) - 1)
    def _():
        mxf = mx_s[...].astype(jnp.float32)
        mean = sum_s[...] * (1.0 / C)
        scale_ref[...] = _conv_bn_sig(mxf, mean, col_ref[...], w_ref, bn_ref,
                                      emx, emn, H, W)


# --- fallback pass 2: lane-dense gating multiply ------------------------------
def _gate_kernel(x_ref, s_ref, o_ref):
    x = x_ref[...]
    o_ref[...] = x * s_ref[...].astype(x.dtype)


@functools.partial(jax.jit, static_argnames=("force_multipass", "c_tile_budget"))
def spatial_gate(x, conv_w, bn_gamma, bn_beta, bn_mean, bn_var,
                 force_multipass=False, c_tile_budget=None):
    N, C, H, W = x.shape
    HW = H * W
    ep = _ext_pad(W)
    Lext = HW + 2 * ep
    itemsize = x.dtype.itemsize

    # Fold inference-mode BatchNorm into an affine scale/bias (conv has no bias).
    bn_scale = bn_gamma / jnp.sqrt(bn_var + BN_EPS)
    bn_bias = bn_beta - bn_mean * bn_scale
    bn_params = jnp.stack([bn_scale[0], bn_bias[0]]).astype(jnp.float32)
    w_flat = conv_w.reshape(-1).astype(jnp.float32)          # (1,2,7,7) -> (98,)
    # Column-index vector (flat index mod W) for the conv's row-bleed masks.
    wcol = (jnp.arange(HW, dtype=jnp.int32) % W).reshape(1, HW)

    x_flat = x.reshape(N, C, HW)                             # lane-dense view
    slab = C * HW * itemsize

    smem_specs = [pl.BlockSpec(memory_space=pltpu.MemorySpace.SMEM),   # conv w
                  pl.BlockSpec(memory_space=pltpu.MemorySpace.SMEM)]   # bn s/b
    cparams = lambda sem: pltpu.CompilerParams(
        dimension_semantics=sem, vmem_limit_bytes=_VMEM_LIMIT)

    # ---- primary path: fully fused single pass per batch element ------------
    fused_need = 4 * slab + 8 * Lext + 16 * HW + (2 << 20)   # in+out dbl-buffered
    if (not force_multipass) and fused_need <= _VMEM_LIMIT:
        out_flat = pl.pallas_call(
            functools.partial(_fused_kernel, C=C, H=H, W=W),
            out_shape=jax.ShapeDtypeStruct((N, C, HW), x.dtype),
            grid_spec=pltpu.PrefetchScalarGridSpec(
                num_scalar_prefetch=0,
                grid=(N,),
                in_specs=smem_specs + [
                    pl.BlockSpec((1, HW), lambda n: (0, 0)),          # wcol
                    pl.BlockSpec((None, C, HW), lambda n: (n, 0, 0)),  # x
                ],
                out_specs=pl.BlockSpec((None, C, HW), lambda n: (n, 0, 0)),
                scratch_shapes=[pltpu.VMEM((1, Lext), jnp.float32),
                                pltpu.VMEM((1, Lext), jnp.float32)],
            ),
            compiler_params=cparams(("parallel",)),
        )(w_flat, bn_params, wcol, x_flat)
        return out_flat.reshape(N, C, H, W)

    # ---- fallback: channel-tiled two-pass path -------------------------------
    # TODO(synk): extremely large H*W (single 8-channel tile > budget) would
    # additionally need a spatial tile axis; not implemented.
    budget = c_tile_budget if c_tile_budget is not None else min(
        _VMEM_LIMIT // 6, 8 << 20)
    c_tile = _pick_c_tile(C, HW, itemsize, budget)
    n_ct = (C + c_tile - 1) // c_tile
    mask_last = (c_tile < C) and (C % c_tile != 0)

    # Pass 1: pooling reduction over channel tiles + conv/BN/sigmoid epilogue.
    scale = pl.pallas_call(
        functools.partial(_pool_conv_kernel, C=C, c_tile=c_tile, H=H, W=W,
                          mask_last=mask_last),
        out_shape=jax.ShapeDtypeStruct((N, 1, HW), jnp.float32),
        grid_spec=pltpu.PrefetchScalarGridSpec(
            num_scalar_prefetch=0,
            grid=(N, n_ct),
            in_specs=smem_specs + [
                pl.BlockSpec((1, HW), lambda n, c: (0, 0)),            # wcol
                pl.BlockSpec((None, c_tile, HW), lambda n, c: (n, c, 0)),
            ],
            out_specs=pl.BlockSpec((None, 1, HW), lambda n, c: (n, 0, 0)),
            scratch_shapes=[pltpu.VMEM((1, HW), x.dtype),      # running max
                            pltpu.VMEM((1, HW), jnp.float32),  # running sum
                            pltpu.VMEM((1, Lext), jnp.float32),
                            pltpu.VMEM((1, Lext), jnp.float32)],
        ),
        compiler_params=cparams(("parallel", "arbitrary")),
    )(w_flat, bn_params, wcol, x_flat)

    # Pass 2: lane-dense gating multiply (fully parallel).
    out_flat = pl.pallas_call(
        _gate_kernel,
        out_shape=jax.ShapeDtypeStruct((N, C, HW), x.dtype),
        grid_spec=pltpu.PrefetchScalarGridSpec(
            num_scalar_prefetch=0,
            grid=(N, n_ct),
            in_specs=[
                pl.BlockSpec((None, c_tile, HW), lambda n, c: (n, c, 0)),
                pl.BlockSpec((None, 1, HW), lambda n, c: (n, 0, 0)),
            ],
            out_specs=pl.BlockSpec((None, c_tile, HW), lambda n, c: (n, c, 0)),
        ),
        compiler_params=cparams(("parallel", "parallel")),
    )(x_flat, scale)

    return out_flat.reshape(N, C, H, W)


def spatial_gate_ref(x, conv_w, bn_gamma, bn_beta, bn_mean, bn_var):
    """Pure-JAX reference (inference-mode BN)."""
    mx = jnp.max(x, axis=1, keepdims=True)
    mn = jnp.mean(x, axis=1, keepdims=True)
    pooled = jnp.concatenate([mx, mn], axis=1)
    y = jax.lax.conv_general_dilated(
        pooled, conv_w, window_strides=(1, 1),
        padding=((PAD, PAD), (PAD, PAD)),
        dimension_numbers=("NCHW", "OIHW", "NCHW"))
    y = (y - bn_mean[None, :, None, None]) / jnp.sqrt(
        bn_var[None, :, None, None] + BN_EPS)
    y = y * bn_gamma[None, :, None, None] + bn_beta[None, :, None, None]
    return x * jax.nn.sigmoid(y)


if __name__ == "__main__":
    key = jax.random.PRNGKey(0)
    kx, kw, kx2 = jax.random.split(key, 3)

    N, C, H, W = 2, 4, 16, 16
    x = jax.random.normal(kx, (N, C, H, W), dtype=jnp.float32)

    # Conv2d(2, 1, 7) weight: deterministic kaiming-uniform-style init.
    fan_in = 2 * KSIZE * KSIZE
    bound = 1.0 / (fan_in ** 0.5)
    conv_w = jax.random.uniform(kw, (1, 2, KSIZE, KSIZE), jnp.float32,
                                -bound, bound)

    # BatchNorm2d(1) default parameters / running stats.
    bn_gamma = jnp.ones((1,), jnp.float32)
    bn_beta = jnp.zeros((1,), jnp.float32)
    bn_mean = jnp.zeros((1,), jnp.float32)
    bn_var = jnp.ones((1,), jnp.float32)
    # TODO(synk): training-mode BatchNorm (batch statistics + running-stat
    # update) is not modeled; inference-mode BN with running stats is used.

    # Primary fused single-pass path.
    out = jax.block_until_ready(
        spatial_gate(x, conv_w, bn_gamma, bn_beta, bn_mean, bn_var))
    ref = spatial_gate_ref(x, conv_w, bn_gamma, bn_beta, bn_mean, bn_var)
    assert jnp.allclose(out, ref, atol=2e-5, rtol=2e-5), float(
        jnp.max(jnp.abs(out - ref)))

    # Also exercise the tiled multi-pass fallback (channel tiling + masked
    # last tile + partial gate blocks).
    x2 = jax.random.normal(kx2, (1, 20, 8, 16), dtype=jnp.float32)
    out2 = jax.block_until_ready(
        spatial_gate(x2, conv_w, bn_gamma, bn_beta, bn_mean, bn_var,
                     force_multipass=True, c_tile_budget=1024))
    ref2 = spatial_gate_ref(x2, conv_w, bn_gamma, bn_beta, bn_mean, bn_var)
    assert jnp.allclose(out2, ref2, atol=2e-5, rtol=2e-5), float(
        jnp.max(jnp.abs(out2 - ref2)))

    print("KERNEL_OK")
</pallas_src>

<mosaic_0001>
module attributes {stable_mosaic.version = 11 : i64} {
  func.func @_fused_kernel(%arg0: i32, %arg1: memref<98xf32, #tpu.memory_space<smem>>, %arg2: memref<2xf32, #tpu.memory_space<smem>>, %arg3: memref<1x256xi32, #tpu.memory_space<vmem>>, %arg4: memref<1x4x256xf32, #tpu.memory_space<vmem>>, %arg5: memref<1x4x256xf32, #tpu.memory_space<vmem>>, %arg6: memref<1x512xf32, #tpu.memory_space<vmem>>, %arg7: memref<1x512xf32, #tpu.memory_space<vmem>>) attributes {dimension_semantics = [#tpu.dimension_semantics<parallel>], iteration_bounds = array<i64: 2>, scalar_prefetch = 0 : i64, scratch_operands = 2 : i64, tpu.core_type = #tpu.core_type<tc>, window_params = [{transform_indices = @transform_0, window_bounds = array<i64: 98>}, {transform_indices = @transform_1, window_bounds = array<i64: 2>}, {pipeline_mode = #tpu.pipeline_mode<synchronous>, transform_indices = @transform_2, window_bounds = array<i64: 1, 256>}, {transform_indices = @transform_3, window_bounds = array<i64: 1, 4, 256>}, {transform_indices = @transform_4, window_bounds = array<i64: 1, 4, 256>}]} {
    %c0 = arith.constant 0 : index
    %c0_0 = arith.constant 0 : index
    %c0_1 = arith.constant 0 : index
    %0 = vector.load %arg4[%c0, %c0_0, %c0_1] : memref<1x4x256xf32, #tpu.memory_space<vmem>>, vector<1x4x256xf32>
    %1 = vector.shape_cast %0 : vector<1x4x256xf32> to vector<4x256xf32>
    %cst = arith.constant dense<0xFF800000> : vector<256xf32>
    %2 = vector.multi_reduction <maximumf>, %1, %cst [0] : vector<4x256xf32> to vector<256xf32>
    %3 = vector.shape_cast %2 : vector<256xf32> to vector<1x256xf32>
    %c0_2 = arith.constant 0 : index
    %c0_3 = arith.constant 0 : index
    %c0_4 = arith.constant 0 : index
    %4 = vector.load %arg4[%c0_2, %c0_3, %c0_4] : memref<1x4x256xf32, #tpu.memory_space<vmem>>, vector<1x4x256xf32>
    %5 = vector.shape_cast %4 : vector<1x4x256xf32> to vector<4x256xf32>
    %cst_5 = arith.constant dense<0.000000e+00> : vector<256xf32>
    %6 = vector.multi_reduction <add>, %5, %cst_5 [0] : vector<4x256xf32> to vector<256xf32>
    %7 = vector.shape_cast %6 : vector<256xf32> to vector<1x256xf32>
    %cst_6 = arith.constant 2.500000e-01 : f32
    %8 = vector.broadcast %cst_6 : f32 to vector<1x256xf32>
    %9 = arith.mulf %7, %8 : vector<1x256xf32>
    %c0_7 = arith.constant 0 : index
    %c0_8 = arith.constant 0 : index
    %10 = vector.load %arg3[%c0_7, %c0_8] : memref<1x256xi32, #tpu.memory_space<vmem>>, vector<1x256xi32>
    %cst_9 = arith.constant 0.000000e+00 : f32
    %11 = vector.broadcast %cst_9 : f32 to vector<1x512xf32>
    %c0_10 = arith.constant 0 : index
    %c0_11 = arith.constant 0 : index
    %12 = vector.load %arg6[%c0_10, %c0_11] : memref<1x512xf32, #tpu.memory_space<vmem>>, vector<1x512xf32>
    tpu.vector_store %arg6[%c0_10, %c0_11], %11 {strides = array<i32>} : memref<1x512xf32, #tpu.memory_space<vmem>>, vector<1x512xf32>,
    %cst_12 = arith.constant 0.000000e+00 : f32
    %13 = vector.broadcast %cst_12 : f32 to vector<1x512xf32>
    %c0_13 = arith.constant 0 : index
    %c0_14 = arith.constant 0 : index
    %14 = vector.load %arg7[%c0_13, %c0_14] : memref<1x512xf32, #tpu.memory_space<vmem>>, vector<1x512xf32>
    tpu.vector_store %arg7[%c0_13, %c0_14], %13 {strides = array<i32>} : memref<1x512xf32, #tpu.memory_space<vmem>>, vector<1x512xf32>,
    %c0_15 = arith.constant 0 : index
    %c128 = arith.constant 128 : index
    %15 = vector.load %arg6[%c0_15, %c128] : memref<1x512xf32, #tpu.memory_space<vmem>>, vector<1x256xf32>
    tpu.vector_store %arg6[%c0_15, %c128], %3 {strides = array<i32>} : memref<1x512xf32, #tpu.memory_space<vmem>>, vector<1x256xf32>,
    %c0_16 = arith.constant 0 : index
    %c128_17 = arith.constant 128 : index
    %16 = vector.load %arg7[%c0_16, %c128_17] : memref<1x512xf32, #tpu.memory_space<vmem>>, vector<1x256xf32>
    tpu.vector_store %arg7[%c0_16, %c128_17], %9 {strides = array<i32>} : memref<1x512xf32, #tpu.memory_space<vmem>>, vector<1x256xf32>,
    %c3_i32 = arith.constant 3 : i32
    %17 = vector.broadcast %c3_i32 : i32 to vector<1x256xi32>
    %18 = arith.cmpi sge, %10, %17 : vector<1x256xi32>
    %c19_i32 = arith.constant 19 : i32
    %19 = vector.broadcast %c19_i32 : i32 to vector<1x256xi32>
    %20 = arith.cmpi slt, %10, %19 : vector<1x256xi32>
    %21 = arith.andi %18, %20 : vector<1x256xi1>
    %c2_i32 = arith.constant 2 : i32
    %22 = vector.broadcast %c2_i32 : i32 to vector<1x256xi32>
    %23 = arith.cmpi sge, %10, %22 : vector<1x256xi32>
    %c18_i32 = arith.constant 18 : i32
    %24 = vector.broadcast %c18_i32 : i32 to vector<1x256xi32>
    %25 = arith.cmpi slt, %10, %24 : vector<1x256xi32>
    %26 = arith.andi %23, %25 : vector<1x256xi1>
    %c1_i32 = arith.constant 1 : i32
    %27 = vector.broadcast %c1_i32 : i32 to vector<1x256xi32>
    %28 = arith.cmpi sge, %10, %27 : vector<1x256xi32>
    %c17_i32 = arith.constant 17 : i32
    %29 = vector.broadcast %c17_i32 : i32 to vector<1x256xi32>
    %30 = arith.cmpi slt, %10, %29 : vector<1x256xi32>
    %31 = arith.andi %28, %30 : vector<1x256xi1>
    %c-1_i32 = arith.constant -1 : i32
    %32 = vector.broadcast %c-1_i32 : i32 to vector<1x256xi32>
    %33 = arith.cmpi sge, %10, %32 : vector<1x256xi32>
    %c15_i32 = arith.constant 15 : i32
    %34 = vector.broadcast %c15_i32 : i32 to vector<1x256xi32>
    %35 = arith.cmpi slt, %10, %34 : vector<1x256xi32>
    %36 = arith.andi %33, %35 : vector<1x256xi1>
    %c-2_i32 = arith.constant -2 : i32
    %37 = vector.broadcast %c-2_i32 : i32 to vector<1x256xi32>
    %38 = arith.cmpi sge, %10, %37 : vector<1x256xi32>
    %c14_i32 = arith.constant 14 : i32
    %39 = vector.broadcast %c14_i32 : i32 to vector<1x256xi32>
    %40 = arith.cmpi slt, %10, %39 : vector<1x256xi32>
    %41 = arith.andi %38, %40 : vector<1x256xi1>
    %c-3_i32 = arith.constant -3 : i32
    %42 = vector.broadcast %c-3_i32 : i32 to vector<1x256xi32>
    %43 = arith.cmpi sge, %10, %42 : vector<1x256xi32>
    %c13_i32 = arith.constant 13 : i32
    %44 = vector.broadcast %c13_i32 : i32 to vector<1x256xi32>
    %45 = arith.cmpi slt, %10, %44 : vector<1x256xi32>
    %46 = arith.andi %43, %45 : vector<1x256xi1>
    %cst_18 = arith.constant 0.000000e+00 : f32
    %47 = vector.broadcast %cst_18 : f32 to vector<1x256xf32>
    %c0_19 = arith.constant 0 : index
    %48 = memref.load %arg1[%c0_19] : memref<98xf32, #tpu.memory_space<smem>>
    %c0_20 = arith.constant 0 : index
    %c77 = arith.constant 77 : index
    %49 = vector.load %arg6[%c0_20, %c77] : memref<1x512xf32, #tpu.memory_space<vmem>>, vector<1x256xf32>
    %cst_21 = arith.constant 0.000000e+00 : f32
    %50 = vector.broadcast %cst_21 : f32 to vector<1x256xf32>
    %51 = arith.select %21, %49, %50 : vector<1x256xi1>, vector<1x256xf32>
    %52 = vector.broadcast %48 : f32 to vector<1x256xf32>
    %53 = arith.mulf %52, %51 : vector<1x256xf32>
    %54 = arith.addf %47, %53 : vector<1x256xf32>
    %c1 = arith.constant 1 : index
    %55 = memref.load %arg1[%c1] : memref<98xf32, #tpu.memory_space<smem>>
    %c0_22 = arith.constant 0 : index
    %c78 = arith.constant 78 : index
    %56 = vector.load %arg6[%c0_22, %c78] : memref<1x512xf32, #tpu.memory_space<vmem>>, vector<1x256xf32>
    %cst_23 = arith.constant 0.000000e+00 : f32
    %57 = vector.broadcast %cst_23 : f32 to vector<1x256xf32>
    %58 = arith.select %26, %56, %57 : vector<1x256xi1>, vector<1x256xf32>
    %59 = vector.broadcast %55 : f32 to vector<1x256xf32>
    %60 = arith.mulf %59, %58 : vector<1x256xf32>
    %61 = arith.addf %54, %60 : vector<1x256xf32>
    %c2 = arith.constant 2 : index
    %62 = memref.load %arg1[%c2] : memref<98xf32, #tpu.memory_space<smem>>
    %c0_24 = arith.constant 0 : index
    %c79 = arith.constant 79 : index
    %63 = vector.load %arg6[%c0_24, %c79] : memref<1x512xf32, #tpu.memory_space<vmem>>, vector<1x256xf32>
    %cst_25 = arith.constant 0.000000e+00 : f32
    %64 = vector.broadcast %cst_25 : f32 to vector<1x256xf32>
    %65 = arith.select %31, %63, %64 : vector<1x256xi1>, vector<1x256xf32>
    %66 = vector.broadcast %62 : f32 to vector<1x256xf32>
    %67 = arith.mulf %66, %65 : vector<1x256xf32>
    %68 = arith.addf %61, %67 : vector<1x256xf32>
    %c3 = arith.constant 3 : index
    %69 = memref.load %arg1[%c3] : memref<98xf32, #tpu.memory_space<smem>>
    %c0_26 = arith.constant 0 : index
    %c80 = arith.constant 80 : index
    %70 = vector.load %arg6[%c0_26, %c80] : memref<1x512xf32, #tpu.memory_space<vmem>>, vector<1x256xf32>
    %71 = vector.broadcast %69 : f32 to vector<1x256xf32>
    %72 = arith.mulf %71, %70 : vector<1x256xf32>
    %73 = arith.addf %68, %72 : vector<1x256xf32>
    %c4 = arith.constant 4 : index
    %74 = memref.load %arg1[%c4] : memref<98xf32, #tpu.memory_space<smem>>
    %c0_27 = arith.constant 0 : index
    %c81 = arith.constant 81 : index
    %75 = vector.load %arg6[%c0_27, %c81] : memref<1x512xf32, #tpu.memory_space<vmem>>, vector<1x256xf32>
    %cst_28 = arith.constant 0.000000e+00 : f32
    %76 = vector.broadcast %cst_28 : f32 to vector<1x256xf32>
    %77 = arith.select %36, %75, %76 : vector<1x256xi1>, vector<1x256xf32>
    %78 = vector.broadcast %74 : f32 to vector<1x256xf32>
    %79 = arith.mulf %78, %77 : vector<1x256xf32>
    %80 = arith.addf %73, %79 : vector<1x256xf32>
    %c5 = arith.constant 5 : index
    %81 = memref.load %arg1[%c5] : memref<98xf32, #tpu.memory_space<smem>>
    %c0_29 = arith.constant 0 : index
    %c82 = arith.constant 82 : index
    %82 = vector.load %arg6[%c0_29, %c82] : memref<1x512xf32, #tpu.memory_space<vmem>>, vector<1x256xf32>
    %cst_30 = arith.constant 0.000000e+00 : f32
    %83 = vector.broadcast %cst_30 : f32 to vector<1x256xf32>
    %84 = arith.select %41, %82, %83 : vector<1x256xi1>, vector<1x256xf32>
    %85 = vector.broadcast %81 : f32 to vector<1x256xf32>
    %86 = arith.mulf %85, %84 : vector<1x256xf32>
    %87 = arith.addf %80, %86 : vector<1x256xf32>
    %c6 = arith.constant 6 : index
    %88 = memref.load %arg1[%c6] : memref<98xf32, #tpu.memory_space<smem>>
    %c0_31 = arith.constant 0 : index
    %c83 = arith.constant 83 : index
    %89 = vector.load %arg6[%c0_31, %c83] : memref<1x512xf32, #tpu.memory_space<vmem>>, vector<1x256xf32>
    %cst_32 = arith.constant 0.000000e+00 : f32
    %90 = vector.broadcast %cst_32 : f32 to vector<1x256xf32>
    %91 = arith.select %46, %89, %90 : vector<1x256xi1>, vector<1x256xf32>
    %92 = vector.broadcast %88 : f32 to vector<1x256xf32>
    %93 = arith.mulf %92, %91 : vector<1x256xf32>
    %94 = arith.addf %87, %93 : vector<1x256xf32>
    %c7 = arith.constant 7 : index
    %95 = memref.load %arg1[%c7] : memref<98xf32, #tpu.memory_space<smem>>
    %c0_33 = arith.constant 0 : index
    %c93 = arith.constant 93 : index
    %96 = vector.load %arg6[%c0_33, %c93] : memref<1x512xf32, #tpu.memory_space<vmem>>, vector<1x256xf32>
    %cst_34 = arith.constant 0.000000e+00 : f32
    %97 = vector.broadcast %cst_34 : f32 to vector<1x256xf32>
    %98 = arith.select %21, %96, %97 : vector<1x256xi1>, vector<1x256xf32>
    %99 = vector.broadcast %95 : f32 to vector<1x256xf32>
    %100 = arith.mulf %99, %98 : vector<1x256xf32>
    %101 = arith.addf %94, %100 : vector<1x256xf32>
    %c8 = arith.constant 8 : index
    %102 = memref.load %arg1[%c8] : memref<98xf32, #tpu.memory_space<smem>>
    %c0_35 = arith.constant 0 : index
    %c94 = arith.constant 94 : index
    %103 = vector.load %arg6[%c0_35, %c94] : memref<1x512xf32, #tpu.memory_space<vmem>>, vector<1x256xf32>
    %cst_36 = arith.constant 0.000000e+00 : f32
    %104 = vector.broadcast %cst_36 : f32 to vector<1x256xf32>
    %105 = arith.select %26, %103, %104 : vector<1x256xi1>, vector<1x256xf32>
    %106 = vector.broadcast %102 : f32 to vector<1x256xf32>
    %107 = arith.mulf %106, %105 : vector<1x256xf32>
    %108 = arith.addf %101, %107 : vector<1x256xf32>
    %c9 = arith.constant 9 : index
    %109 = memref.load %arg1[%c9] : memref<98xf32, #tpu.memory_space<smem>>
    %c0_37 = arith.constant 0 : index
    %c95 = arith.constant 95 : index
    %110 = vector.load %arg6[%c0_37, %c95] : memref<1x512xf32, #tpu.memory_space<vmem>>, vector<1x256xf32>
    %cst_38 = arith.constant 0.000000e+00 : f32
    %111 = vector.broadcast %cst_38 : f32 to vector<1x256xf32>
    %112 = arith.select %31, %110, %111 : vector<1x256xi1>, vector<1x256xf32>
    %113 = vector.broadcast %109 : f32 to vector<1x256xf32>
    %114 = arith.mulf %113, %112 : vector<1x256xf32>
    %115 = arith.addf %108, %114 : vector<1x256xf32>
    %c10 = arith.constant 10 : index
    %116 = memref.load %arg1[%c10] : memref<98xf32, #tpu.memory_space<smem>>
    %c0_39 = arith.constant 0 : index
    %c96 = arith.constant 96 : index
    %117 = vector.load %arg6[%c0_39, %c96] : memref<1x512xf32, #tpu.memory_space<vmem>>, vector<1x256xf32>
    %118 = vector.broadcast %116 : f32 to vector<1x256xf32>
    %119 = arith.mulf %118, %117 : vector<1x256xf32>
    %120 = arith.addf %115, %119 : vector<1x256xf32>
    %c11 = arith.constant 11 : index
    %121 = memref.load %arg1[%c11] : memref<98xf32, #tpu.memory_space<smem>>
    %c0_40 = arith.constant 0 : index
    %c97 = arith.constant 97 : index
    %122 = vector.load %arg6[%c0_40, %c97] : memref<1x512xf32, #tpu.memory_space<vmem>>, vector<1x256xf32>
    %cst_41 = arith.constant 0.000000e+00 : f32
    %123 = vector.broadcast %cst_41 : f32 to vector<1x256xf32>
    %124 = arith.select %36, %122, %123 : vector<1x256xi1>, vector<1x256xf32>
    %125 = vector.broadcast %121 : f32 to vector<1x256xf32>
    %126 = arith.mulf %125, %124 : vector<1x256xf32>
    %127 = arith.addf %120, %126 : vector<1x256xf32>
    %c12 = arith.constant 12 : index
    %128 = memref.load %arg1[%c12] : memref<98xf32, #tpu.memory_space<smem>>
    %c0_42 = arith.constant 0 : index
    %c98 = arith.constant 98 : index
    %129 = vector.load %arg6[%c0_42, %c98] : memref<1x512xf32, #tpu.memory_space<vmem>>, vector<1x256xf32>
    %cst_43 = arith.constant 0.000000e+00 : f32
    %130 = vector.broadcast %cst_43 : f32 to vector<1x256xf32>
    %131 = arith.select %41, %129, %130 : vector<1x256xi1>, vector<1x256xf32>
    %132 = vector.broadcast %128 : f32 to vector<1x256xf32>
    %133 = arith.mulf %132, %131 : vector<1x256xf32>
    %134 = arith.addf %127, %133 : vector<1x256xf32>
    %c13 = arith.constant 13 : index
    %135 = memref.load %arg1[%c13] : memref<98xf32, #tpu.memory_space<smem>>
    %c0_44 = arith.constant 0 : index
    %c99 = arith.constant 99 : index
    %136 = vector.load %arg6[%c0_44, %c99] : memref<1x512xf32, #tpu.memory_space<vmem>>, vector<1x256xf32>
    %cst_45 = arith.constant 0.000000e+00 : f32
    %137 = vector.broadcast %cst_45 : f32 to vector<1x256xf32>
    %138 = arith.select %46, %136, %137 : vector<1x256xi1>, vector<1x256xf32>
    %139 = vector.broadcast %135 : f32 to vector<1x256xf32>
    %140 = arith.mulf %139, %138 : vector<1x256xf32>
    %141 = arith.addf %134, %140 : vector<1x256xf32>
    %c14 = arith.constant 14 : index
    %142 = memref.load %arg1[%c14] : memref<98xf32, #tpu.memory_space<smem>>
    %c0_46 = arith.constant 0 : index
    %c109 = arith.constant 109 : index
    %143 = vector.load %arg6[%c0_46, %c109] : memref<1x512xf32, #tpu.memory_space<vmem>>, vector<1x256xf32>
    %cst_47 = arith.constant 0.000000e+00 : f32
    %144 = vector.broadcast %cst_47 : f32 to vector<1x256xf32>
    %145 = arith.select %21, %143, %144 : vector<1x256xi1>, vector<1x256xf32>
    %146 = vector.broadcast %142 : f32 to vector<1x256xf32>
    %147 = arith.mulf %146, %145 : vector<1x256xf32>
    %148 = arith.addf %141, %147 : vector<1x256xf32>
    %c15 = arith.constant 15 : index
    %149 = memref.load %arg1[%c15] : memref<98xf32, #tpu.memory_space<smem>>
    %c0_48 = arith.constant 0 : index
    %c110 = arith.constant 110 : index
    %150 = vector.load %arg6[%c0_48, %c110] : memref<1x512xf32, #tpu.memory_space<vmem>>, vector<1x256xf32>
    %cst_49 = arith.constant 0.000000e+00 : f32
    %151 = vector.broadcast %cst_49 : f32 to vector<1x256xf32>
    %152 = arith.select %26, %150, %151 : vector<1x256xi1>, vector<1x256xf32>
    %153 = vector.broadcast %149 : f32 to vector<1x256xf32>
    %154 = arith.mulf %153, %152 : vector<1x256xf32>
    %155 = arith.addf %148, %154 : vector<1x256xf32>
    %c16 = arith.constant 16 : index
    %156 = memref.load %arg1[%c16] : memref<98xf32, #tpu.memory_space<smem>>
    %c0_50 = arith.constant 0 : index
    %c111 = arith.constant 111 : index
    %157 = vector.load %arg6[%c0_50, %c111] : memref<1x512xf32, #tpu.memory_space<vmem>>, vector<1x256xf32>
    %cst_51 = arith.constant 0.000000e+00 : f32
    %158 = vector.broadcast %cst_51 : f32 to vector<1x256xf32>
    %159 = arith.select %31, %157, %158 : vector<1x256xi1>, vector<1x256xf32>
    %160 = vector.broadcast %156 : f32 to vector<1x256xf32>
    %161 = arith.mulf %160, %159 : vector<1x256xf32>
    %162 = arith.addf %155, %161 : vector<1x256xf32>
    %c17 = arith.constant 17 : index
    %163 = memref.load %arg1[%c17] : memref<98xf32, #tpu.memory_space<smem>>
    %c0_52 = arith.constant 0 : index
    %c112 = arith.constant 112 : index
    %164 = vector.load %arg6[%c0_52, %c112] : memref<1x512xf32, #tpu.memory_space<vmem>>, vector<1x256xf32>
    %165 = vector.broadcast %163 : f32 to vector<1x256xf32>
    %166 = arith.mulf %165, %164 : vector<1x256xf32>
    %167 = arith.addf %162, %166 : vector<1x256xf32>
    %c18 = arith.constant 18 : index
    %168 = memref.load %arg1[%c18] : memref<98xf32, #tpu.memory_space<smem>>
    %c0_53 = arith.constant 0 : index
    %c113 = arith.constant 113 : index
    %169 = vector.load %arg6[%c0_53, %c113] : memref<1x512xf32, #tpu.memory_space<vmem>>, vector<1x256xf32>
    %cst_54 = arith.constant 0.000000e+00 : f32
    %170 = vector.broadcast %cst_54 : f32 to vector<1x256xf32>
    %171 = arith.select %36, %169, %170 : vector<1x256xi1>, vector<1x256xf32>
    %172 = vector.broadcast %168 : f32 to vector<1x256xf32>
    %173 = arith.mulf %172, %171 : vector<1x256xf32>
    %174 = arith.addf %167, %173 : vector<1x256xf32>
    %c19 = arith.constant 19 : index
    %175 = memref.load %arg1[%c19] : memref<98xf32, #tpu.memory_space<smem>>
    %c0_55 = arith.constant 0 : index
    %c114 = arith.constant 114 : index
    %176 = vector.load %arg6[%c0_55, %c114] : memref<1x512xf32, #tpu.memory_space<vmem>>, vector<1x256xf32>
    %cst_56 = arith.constant 0.000000e+00 : f32
    %177 = vector.broadcast %cst_56 : f32 to vector<1x256xf32>
    %178 = arith.select %41, %176, %177 : vector<1x256xi1>, vector<1x256xf32>
    %179 = vector.broadcast %175 : f32 to vector<1x256xf32>
    %180 = arith.mulf %179, %178 : vector<1x256xf32>
    %181 = arith.addf %174, %180 : vector<1x256xf32>
    %c20 = arith.constant 20 : index
    %182 = memref.load %arg1[%c20] : memref<98xf32, #tpu.memory_space<smem>>
    %c0_57 = arith.constant 0 : index
    %c115 = arith.constant 115 : index
    %183 = vector.load %arg6[%c0_57, %c115] : memref<1x512xf32, #tpu.memory_space<vmem>>, vector<1x256xf32>
    %cst_58 = arith.constant 0.000000e+00 : f32
    %184 = vector.broadcast %cst_58 : f32 to vector<1x256xf32>
    %185 = arith.select %46, %183, %184 : vector<1x256xi1>, vector<1x256xf32>
    %186 = vector.broadcast %182 : f32 to vector<1x256xf32>
    %187 = arith.mulf %186, %185 : vector<1x256xf32>
    %188 = arith.addf %181, %187 : vector<1x256xf32>
    %c21 = arith.constant 21 : index
    %189 = memref.load %arg1[%c21] : memref<98xf32, #tpu.memory_space<smem>>
    %c0_59 = arith.constant 0 : index
    %c125 = arith.constant 125 : index
    %190 = vector.load %arg6[%c0_59, %c125] : memref<1x512xf32, #tpu.memory_space<vmem>>, vector<1x256xf32>
    %cst_60 = arith.constant 0.000000e+00 : f32
    %191 = vector.broadcast %cst_60 : f32 to vector<1x256xf32>
    %192 = arith.select %21, %190, %191 : vector<1x256xi1>, vector<1x256xf32>
    %193 = vector.broadcast %189 : f32 to vector<1x256xf32>
    %194 = arith.mulf %193, %192 : vector<1x256xf32>
    %195 = arith.addf %188, %194 : vector<1x256xf32>
    %c22 = arith.constant 22 : index
    %196 = memref.load %arg1[%c22] : memref<98xf32, #tpu.memory_space<smem>>
    %c0_61 = arith.constant 0 : index
    %c126 = arith.constant 126 : index
    %197 = vector.load %arg6[%c0_61, %c126] : memref<1x512xf32, #tpu.memory_space<vmem>>, vector<1x256xf32>
    %cst_62 = arith.constant 0.000000e+00 : f32
    %198 = vector.broadcast %cst_62 : f32 to vector<1x256xf32>
    %199 = arith.select %26, %197, %198 : vector<1x256xi1>, vector<1x256xf32>
    %200 = vector.broadcast %196 : f32 to vector<1x256xf32>
    %201 = arith.mulf %200, %199 : vector<1x256xf32>
    %202 = arith.addf %195, %201 : vector<1x256xf32>
    %c23 = arith.constant 23 : index
    %203 = memref.load %arg1[%c23] : memref<98xf32, #tpu.memory_space<smem>>
    %c0_63 = arith.constant 0 : index
    %c127 = arith.constant 127 : index
    %204 = vector.load %arg6[%c0_63, %c127] : memref<1x512xf32, #tpu.memory_space<vmem>>, vector<1x256xf32>
    %cst_64 = arith.constant 0.000000e+00 : f32
    %205 = vector.broadcast %cst_64 : f32 to vector<1x256xf32>
    %206 = arith.select %31, %204, %205 : vector<1x256xi1>, vector<1x256xf32>
    %207 = vector.broadcast %203 : f32 to vector<1x256xf32>
    %208 = arith.mulf %207, %206 : vector<1x256xf32>
    %209 = arith.addf %202, %208 : vector<1x256xf32>
    %c24 = arith.constant 24 : index
    %210 = memref.load %arg1[%c24] : memref<98xf32, #tpu.memory_space<smem>>
    %c0_65 = arith.constant 0 : index
    %c128_66 = arith.constant 128 : index
    %211 = vector.load %arg6[%c0_65, %c128_66] : memref<1x512xf32, #tpu.memory_space<vmem>>, vector<1x256xf32>
    %212 = vector.broadcast %210 : f32 to vector<1x256xf32>
    %213 = arith.mulf %212, %211 : vector<1x256xf32>
    %214 = arith.addf %209, %213 : vector<1x256xf32>
    %c25 = arith.constant 25 : index
    %215 = memref.load %arg1[%c25] : memref<98xf32, #tpu.memory_space<smem>>
    %c0_67 = arith.constant 0 : index
    %c129 = arith.constant 129 : index
    %216 = vector.load %arg6[%c0_67, %c129] : memref<1x512xf32, #tpu.memory_space<vmem>>, vector<1x256xf32>
    %cst_68 = arith.constant 0.000000e+00 : f32
    %217 = vector.broadcast %cst_68 : f32 to vector<1x256xf32>
    %218 = arith.select %36, %216, %217 : vector<1x256xi1>, vector<1x256xf32>
    %219 = vector.broadcast %215 : f32 to vector<1x256xf32>
    %220 = arith.mulf %219, %218 : vector<1x256xf32>
    %221 = arith.addf %214, %220 : vector<1x256xf32>
    %c26 = arith.constant 26 : index
    %222 = memref.load %arg1[%c26] : memref<98xf32, #tpu.memory_space<smem>>
    %c0_69 = arith.constant 0 : index
    %c130 = arith.constant 130 : index
    %223 = vector.load %arg6[%c0_69, %c130] : memref<1x512xf32, #tpu.memory_space<vmem>>, vector<1x256xf32>
    %cst_70 = arith.constant 0.000000e+00 : f32
    %224 = vector.broadcast %cst_70 : f32 to vector<1x256xf32>
    %225 = arith.select %41, %223, %224 : vector<1x256xi1>, vector<1x256xf32>
    %226 = vector.broadcast %222 : f32 to vector<1x256xf32>
    %227 = arith.mulf %226, %225 : vector<1x256xf32>
    %228 = arith.addf %221, %227 : vector<1x256xf32>
    %c27 = arith.constant 27 : index
    %229 = memref.load %arg1[%c27] : memref<98xf32, #tpu.memory_space<smem>>
    %c0_71 = arith.constant 0 : index
    %c131 = arith.constant 131 : index
    %230 = vector.load %arg6[%c0_71, %c131] : memref<1x512xf32, #tpu.memory_space<vmem>>, vector<1x256xf32>
    %cst_72 = arith.constant 0.000000e+00 : f32
    %231 = vector.broadcast %cst_72 : f32 to vector<1x256xf32>
    %232 = arith.select %46, %230, %231 : vector<1x256xi1>, vector<1x256xf32>
    %233 = vector.broadcast %229 : f32 to vector<1x256xf32>
    %234 = arith.mulf %233, %232 : vector<1x256xf32>
    %235 = arith.addf %228, %234 : vector<1x256xf32>
    %c28 = arith.constant 28 : index
    %236 = memref.load %arg1[%c28] : memref<98xf32, #tpu.memory_space<smem>>
    %c0_73 = arith.constant 0 : index
    %c141 = arith.constant 141 : index
    %237 = vector.load %arg6[%c0_73, %c141] : memref<1x512xf32, #tpu.memory_space<vmem>>, vector<1x256xf32>
    %cst_74 = arith.constant 0.000000e+00 : f32
    %238 = vector.broadcast %cst_74 : f32 to vector<1x256xf32>
    %239 = arith.select %21, %237, %238 : vector<1x256xi1>, vector<1x256xf32>
    %240 = vector.broadcast %236 : f32 to vector<1x256xf32>
    %241 = arith.mulf %240, %239 : vector<1x256xf32>
    %242 = arith.addf %235, %241 : vector<1x256xf32>
    %c29 = arith.constant 29 : index
    %243 = memref.load %arg1[%c29] : memref<98xf32, #tpu.memory_space<smem>>
    %c0_75 = arith.constant 0 : index
    %c142 = arith.constant 142 : index
    %244 = vector.load %arg6[%c0_75, %c142] : memref<1x512xf32, #tpu.memory_space<vmem>>, vector<1x256xf32>
    %cst_76 = arith.constant 0.000000e+00 : f32
    %245 = vector.broadcast %cst_76 : f32 to vector<1x256xf32>
    %246 = arith.select %26, %244, %245 : vector<1x256xi1>, vector<1x256xf32>
    %247 = vector.broadcast %243 : f32 to vector<1x256xf32>
    %248 = arith.mulf %247, %246 : vector<1x256xf32>
    %249 = arith.addf %242, %248 : vector<1x256xf32>
    %c30 = arith.constant 30 : index
    %250 = memref.load %arg1[%c30] : memref<98xf32, #tpu.memory_space<smem>>
    %c0_77 = arith.constant 0 : index
    %c143 = arith.constant 143 : index
    %251 = vector.load %arg6[%c0_77, %c143] : memref<1x512xf32, #tpu.memory_space<vmem>>, vector<1x256xf32>
    %cst_78 = arith.constant 0.000000e+00 : f32
    %252 = vector.broadcast %cst_78 : f32 to vector<1x256xf32>
    %253 = arith.select %31, %251, %252 : vector<1x256xi1>, vector<1x256xf32>
    %254 = vector.broadcast %250 : f32 to vector<1x256xf32>
    %255 = arith.mulf %254, %253 : vector<1x256xf32>
    %256 = arith.addf %249, %255 : vector<1x256xf32>
    %c31 = arith.constant 31 : index
    %257 = memref.load %arg1[%c31] : memref<98xf32, #tpu.memory_space<smem>>
    %c0_79 = arith.constant 0 : index
    %c144 = arith.constant 144 : index
    %258 = vector.load %arg6[%c0_79, %c144] : memref<1x512xf32, #tpu.memory_space<vmem>>, vector<1x256xf32>
    %259 = vector.broadcast %257 : f32 to vector<1x256xf32>
    %260 = arith.mulf %259, %258 : vector<1x256xf32>
    %261 = arith.addf %256, %260 : vector<1x256xf32>
    %c32 = arith.constant 32 : index
    %262 = memref.load %arg1[%c32] : memref<98xf32, #tpu.memory_space<smem>>
    %c0_80 = arith.constant 0 : index
    %c145 = arith.constant 145 : index
    %263 = vector.load %arg6[%c0_80, %c145] : memref<1x512xf32, #tpu.memory_space<vmem>>, vector<1x256xf32>
    %cst_81 = arith.constant 0.000000e+00 : f32
    %264 = vector.broadcast %cst_81 : f32 to vector<1x256xf32>
    %265 = arith.select %36, %263, %264 : vector<1x256xi1>, vector<1x256xf32>
    %266 = vector.broadcast %262 : f32 to vector<1x256xf32>
    %267 = arith.mulf %266, %265 : vector<1x256xf32>
    %268 = arith.addf %261, %267 : vector<1x256xf32>
    %c33 = arith.constant 33 : index
    %269 = memref.load %arg1[%c33] : memref<98xf32, #tpu.memory_space<smem>>
    %c0_82 = arith.constant 0 : index
    %c146 = arith.constant 146 : index
    %270 = vector.load %arg6[%c0_82, %c146] : memref<1x512xf32, #tpu.memory_space<vmem>>, vector<1x256xf32>
    %cst_83 = arith.constant 0.000000e+00 : f32
    %271 = vector.broadcast %cst_83 : f32 to vector<1x256xf32>
    %272 = arith.select %41, %270, %271 : vector<1x256xi1>, vector<1x256xf32>
    %273 = vector.broadcast %269 : f32 to vector<1x256xf32>
    %274 = arith.mulf %273, %272 : vector<1x256xf32>
    %275 = arith.addf %268, %274 : vector<1x256xf32>
    %c34 = arith.constant 34 : index
    %276 = memref.load %arg1[%c34] : memref<98xf32, #tpu.memory_space<smem>>
    %c0_84 = arith.constant 0 : index
    %c147 = arith.constant 147 : index
    %277 = vector.load %arg6[%c0_84, %c147] : memref<1x512xf32, #tpu.memory_space<vmem>>, vector<1x256xf32>
    %cst_85 = arith.constant 0.000000e+00 : f32
    %278 = vector.broadcast %cst_85 : f32 to vector<1x256xf32>
    %279 = arith.select %46, %277, %278 : vector<1x256xi1>, vector<1x256xf32>
    %280 = vector.broadcast %276 : f32 to vector<1x256xf32>
    %281 = arith.mulf %280, %279 : vector<1x256xf32>
    %282 = arith.addf %275, %281 : vector<1x256xf32>
    %c35 = arith.constant 35 : index
    %283 = memref.load %arg1[%c35] : memref<98xf32, #tpu.memory_space<smem>>
    %c0_86 = arith.constant 0 : index
    %c157 = arith.constant 157 : index
    %284 = vector.load %arg6[%c0_86, %c157] : memref<1x512xf32, #tpu.memory_space<vmem>>, vector<1x256xf32>
    %cst_87 = arith.constant 0.000000e+00 : f32
    %285 = vector.broadcast %cst_87 : f32 to vector<1x256xf32>
    %286 = arith.select %21, %284, %285 : vector<1x256xi1>, vector<1x256xf32>
    %287 = vector.broadcast %283 : f32 to vector<1x256xf32>
    %288 = arith.mulf %287, %286 : vector<1x256xf32>
    %289 = arith.addf %282, %288 : vector<1x256xf32>
    %c36 = arith.constant 36 : index
    %290 = memref.load %arg1[%c36] : memref<98xf32, #tpu.memory_space<smem>>
    %c0_88 = arith.constant 0 : index
    %c158 = arith.constant 158 : index
    %291 = vector.load %arg6[%c0_88, %c158] : memref<1x512xf32, #tpu.memory_space<vmem>>, vector<1x256xf32>
    %cst_89 = arith.constant 0.000000e+00 : f32
    %292 = vector.broadcast %cst_89 : f32 to vector<1x256xf32>
    %293 = arith.select %26, %291, %292 : vector<1x256xi1>, vector<1x256xf32>
    %294 = vector.broadcast %290 : f32 to vector<1x256xf32>
    %295 = arith.mulf %294, %293 : vector<1x256xf32>
    %296 = arith.addf %289, %295 : vector<1x256xf32>
    %c37 = arith.constant 37 : index
    %297 = memref.load %arg1[%c37] : memref<98xf32, #tpu.memory_space<smem>>
    %c0_90 = arith.constant 0 : index
    %c159 = arith.constant 159 : index
    %298 = vector.load %arg6[%c0_90, %c159] : memref<1x512xf32, #tpu.memory_space<vmem>>, vector<1x256xf32>
    %cst_91 = arith.constant 0.000000e+00 : f32
    %299 = vector.broadcast %cst_91 : f32 to vector<1x256xf32>
    %300 = arith.select %31, %298, %299 : vector<1x256xi1>, vector<1x256xf32>
    %301 = vector.broadcast %297 : f32 to vector<1x256xf32>
    %302 = arith.mulf %301, %300 : vector<1x256xf32>
    %303 = arith.addf %296, %302 : vector<1x256xf32>
    %c38 = arith.constant 38 : index
    %304 = memref.load %arg1[%c38] : memref<98xf32, #tpu.memory_space<smem>>
    %c0_92 = arith.constant 0 : index
    %c160 = arith.constant 160 : index
    %305 = vector.load %arg6[%c0_92, %c160] : memref<1x512xf32, #tpu.memory_space<vmem>>, vector<1x256xf32>
    %306 = vector.broadcast %304 : f32 to vector<1x256xf32>
    %307 = arith.mulf %306, %305 : vector<1x256xf32>
    %308 = arith.addf %303, %307 : vector<1x256xf32>
    %c39 = arith.constant 39 : index
    %309 = memref.load %arg1[%c39] : memref<98xf32, #tpu.memory_space<smem>>
    %c0_93 = arith.constant 0 : index
    %c161 = arith.constant 161 : index
    %310 = vector.load %arg6[%c0_93, %c161] : memref<1x512xf32, #tpu.memory_space<vmem>>, vector<1x256xf32>
    %cst_94 = arith.constant 0.000000e+00 : f32
    %311 = vector.broadcast %cst_94 : f32 to vector<1x256xf32>
    %312 = arith.select %36, %310, %311 : vector<1x256xi1>, vector<1x256xf32>
    %313 = vector.broadcast %309 : f32 to vector<1x256xf32>
    %314 = arith.mulf %313, %312 : vector<1x256xf32>
    %315 = arith.addf %308, %314 : vector<1x256xf32>
    %c40 = arith.constant 40 : index
    %316 = memref.load %arg1[%c40] : memref<98xf32, #tpu.memory_space<smem>>
    %c0_95 = arith.constant 0 : index
    %c162 = arith.constant 162 : index
    %317 = vector.load %arg6[%c0_95, %c162] : memref<1x512xf32, #tpu.memory_space<vmem>>, vector<1x256xf32>
    %cst_96 = arith.constant 0.000000e+00 : f32
    %318 = vector.broadcast %cst_96 : f32 to vector<1x256xf32>
    %319 = arith.select %41, %317, %318 : vector<1x256xi1>, vector<1x256xf32>
    %320 = vector.broadcast %316 : f32 to vector<1x256xf32>
    %321 = arith.mulf %320, %319 : vector<1x256xf32>
    %322 = arith.addf %315, %321 : vector<1x256xf32>
    %c41 = arith.constant 41 : index
    %323 = memref.load %arg1[%c41] : memref<98xf32, #tpu.memory_space<smem>>
    %c0_97 = arith.constant 0 : index
    %c163 = arith.constant 163 : index
    %324 = vector.load %arg6[%c0_97, %c163] : memref<1x512xf32, #tpu.memory_space<vmem>>, vector<1x256xf32>
    %cst_98 = arith.constant 0.000000e+00 : f32
    %325 = vector.broadcast %cst_98 : f32 to vector<1x256xf32>
    %326 = arith.select %46, %324, %325 : vector<1x256xi1>, vector<1x256xf32>
    %327 = vector.broadcast %323 : f32 to vector<1x256xf32>
    %328 = arith.mulf %327, %326 : vector<1x256xf32>
    %329 = arith.addf %322, %328 : vector<1x256xf32>
    %c42 = arith.constant 42 : index
    %330 = memref.load %arg1[%c42] : memref<98xf32, #tpu.memory_space<smem>>
    %c0_99 = arith.constant 0 : index
    %c173 = arith.constant 173 : index
    %331 = vector.load %arg6[%c0_99, %c173] : memref<1x512xf32, #tpu.memory_space<vmem>>, vector<1x256xf32>
    %cst_100 = arith.constant 0.000000e+00 : f32
    %332 = vector.broadcast %cst_100 : f32 to vector<1x256xf32>
    %333 = arith.select %21, %331, %332 : vector<1x256xi1>, vector<1x256xf32>
    %334 = vector.broadcast %330 : f32 to vector<1x256xf32>
    %335 = arith.mulf %334, %333 : vector<1x256xf32>
    %336 = arith.addf %329, %335 : vector<1x256xf32>
    %c43 = arith.constant 43 : index
    %337 = memref.load %arg1[%c43] : memref<98xf32, #tpu.memory_space<smem>>
    %c0_101 = arith.constant 0 : index
    %c174 = arith.constant 174 : index
    %338 = vector.load %arg6[%c0_101, %c174] : memref<1x512xf32, #tpu.memory_space<vmem>>, vector<1x256xf32>
    %cst_102 = arith.constant 0.000000e+00 : f32
    %339 = vector.broadcast %cst_102 : f32 to vector<1x256xf32>
    %340 = arith.select %26, %338, %339 : vector<1x256xi1>, vector<1x256xf32>
    %341 = vector.broadcast %337 : f32 to vector<1x256xf32>
    %342 = arith.mulf %341, %340 : vector<1x256xf32>
    %343 = arith.addf %336, %342 : vector<1x256xf32>
    %c44 = arith.constant 44 : index
    %344 = memref.load %arg1[%c44] : memref<98xf32, #tpu.memory_space<smem>>
    %c0_103 = arith.constant 0 : index
    %c175 = arith.constant 175 : index
    %345 = vector.load %arg6[%c0_103, %c175] : memref<1x512xf32, #tpu.memory_space<vmem>>, vector<1x256xf32>
    %cst_104 = arith.constant 0.000000e+00 : f32
    %346 = vector.broadcast %cst_104 : f32 to vector<1x256xf32>
    %347 = arith.select %31, %345, %346 : vector<1x256xi1>, vector<1x256xf32>
    %348 = vector.broadcast %344 : f32 to vector<1x256xf32>
    %349 = arith.mulf %348, %347 : vector<1x256xf32>
    %350 = arith.addf %343, %349 : vector<1x256xf32>
    %c45 = arith.constant 45 : index
    %351 = memref.load %arg1[%c45] : memref<98xf32, #tpu.memory_space<smem>>
    %c0_105 = arith.constant 0 : index
    %c176 = arith.constant 176 : index
    %352 = vector.load %arg6[%c0_105, %c176] : memref<1x512xf32, #tpu.memory_space<vmem>>, vector<1x256xf32>
    %353 = vector.broadcast %351 : f32 to vector<1x256xf32>
    %354 = arith.mulf %353, %352 : vector<1x256xf32>
    %355 = arith.addf %350, %354 : vector<1x256xf32>
    %c46 = arith.constant 46 : index
    %356 = memref.load %arg1[%c46] : memref<98xf32, #tpu.memory_space<smem>>
    %c0_106 = arith.constant 0 : index
    %c177 = arith.constant 177 : index
    %357 = vector.load %arg6[%c0_106, %c177] : memref<1x512xf32, #tpu.memory_space<vmem>>, vector<1x256xf32>
    %cst_107 = arith.constant 0.000000e+00 : f32
    %358 = vector.broadcast %cst_107 : f32 to vector<1x256xf32>
    %359 = arith.select %36, %357, %358 : vector<1x256xi1>, vector<1x256xf32>
    %360 = vector.broadcast %356 : f32 to vector<1x256xf32>
    %361 = arith.mulf %360, %359 : vector<1x256xf32>
    %362 = arith.addf %355, %361 : vector<1x256xf32>
    %c47 = arith.constant 47 : index
    %363 = memref.load %arg1[%c47] : memref<98xf32, #tpu.memory_space<smem>>
    %c0_108 = arith.constant 0 : index
    %c178 = arith.constant 178 : index
    %364 = vector.load %arg6[%c0_108, %c178] : memref<1x512xf32, #tpu.memory_space<vmem>>, vector<1x256xf32>
    %cst_109 = arith.constant 0.000000e+00 : f32
    %365 = vector.broadcast %cst_109 : f32 to vector<1x256xf32>
    %366 = arith.select %41, %364, %365 : vector<1x256xi1>, vector<1x256xf32>
    %367 = vector.broadcast %363 : f32 to vector<1x256xf32>
    %368 = arith.mulf %367, %366 : vector<1x256xf32>
    %369 = arith.addf %362, %368 : vector<1x256xf32>
    %c48 = arith.constant 48 : index
    %370 = memref.load %arg1[%c48] : memref<98xf32, #tpu.memory_space<smem>>
    %c0_110 = arith.constant 0 : index
    %c179 = arith.constant 179 : index
    %371 = vector.load %arg6[%c0_110, %c179] : memref<1x512xf32, #tpu.memory_space<vmem>>, vector<1x256xf32>
    %cst_111 = arith.constant 0.000000e+00 : f32
    %372 = vector.broadcast %cst_111 : f32 to vector<1x256xf32>
    %373 = arith.select %46, %371, %372 : vector<1x256xi1>, vector<1x256xf32>
    %374 = vector.broadcast %370 : f32 to vector<1x256xf32>
    %375 = arith.mulf %374, %373 : vector<1x256xf32>
    %376 = arith.addf %369, %375 : vector<1x256xf32>
    %c49 = arith.constant 49 : index
    %377 = memref.load %arg1[%c49] : memref<98xf32, #tpu.memory_space<smem>>
    %c0_112 = arith.constant 0 : index
    %c77_113 = arith.constant 77 : index
    %378 = vector.load %arg7[%c0_112, %c77_113] : memref<1x512xf32, #tpu.memory_space<vmem>>, vector<1x256xf32>
    %cst_114 = arith.constant 0.000000e+00 : f32
    %379 = vector.broadcast %cst_114 : f32 to vector<1x256xf32>
    %380 = arith.select %21, %378, %379 : vector<1x256xi1>, vector<1x256xf32>
    %381 = vector.broadcast %377 : f32 to vector<1x256xf32>
    %382 = arith.mulf %381, %380 : vector<1x256xf32>
    %383 = arith.addf %376, %382 : vector<1x256xf32>
    %c50 = arith.constant 50 : index
    %384 = memref.load %arg1[%c50] : memref<98xf32, #tpu.memory_space<smem>>
    %c0_115 = arith.constant 0 : index
    %c78_116 = arith.constant 78 : index
    %385 = vector.load %arg7[%c0_115, %c78_116] : memref<1x512xf32, #tpu.memory_space<vmem>>, vector<1x256xf32>
    %cst_117 = arith.constant 0.000000e+00 : f32
    %386 = vector.broadcast %cst_117 : f32 to vector<1x256xf32>
    %387 = arith.select %26, %385, %386 : vector<1x256xi1>, vector<1x256xf32>
    %388 = vector.broadcast %384 : f32 to vector<1x256xf32>
    %389 = arith.mulf %388, %387 : vector<1x256xf32>
    %390 = arith.addf %383, %389 : vector<1x256xf32>
    %c51 = arith.constant 51 : index
    %391 = memref.load %arg1[%c51] : memref<98xf32, #tpu.memory_space<smem>>
    %c0_118 = arith.constant 0 : index
    %c79_119 = arith.constant 79 : index
    %392 = vector.load %arg7[%c0_118, %c79_119] : memref<1x512xf32, #tpu.memory_space<vmem>>, vector<1x256xf32>
    %cst_120 = arith.constant 0.000000e+00 : f32
    %393 = vector.broadcast %cst_120 : f32 to vector<1x256xf32>
    %394 = arith.select %31, %392, %393 : vector<1x256xi1>, vector<1x256xf32>
    %395 = vector.broadcast %391 : f32 to vector<1x256xf32>
    %396 = arith.mulf %395, %394 : vector<1x256xf32>
    %397 = arith.addf %390, %396 : vector<1x256xf32>
    %c52 = arith.constant 52 : index
    %398 = memref.load %arg1[%c52] : memref<98xf32, #tpu.memory_space<smem>>
    %c0_121 = arith.constant 0 : index
    %c80_122 = arith.constant 80 : index
    %399 = vector.load %arg7[%c0_121, %c80_122] : memref<1x512xf32, #tpu.memory_space<vmem>>, vector<1x256xf32>
    %400 = vector.broadcast %398 : f32 to vector<1x256xf32>
    %401 = arith.mulf %400, %399 : vector<1x256xf32>
    %402 = arith.addf %397, %401 : vector<1x256xf32>
    %c53 = arith.constant 53 : index
    %403 = memref.load %arg1[%c53] : memref<98xf32, #tpu.memory_space<smem>>
    %c0_123 = arith.constant 0 : index
    %c81_124 = arith.constant 81 : index
    %404 = vector.load %arg7[%c0_123, %c81_124] : memref<1x512xf32, #tpu.memory_space<vmem>>, vector<1x256xf32>
    %cst_125 = arith.constant 0.000000e+00 : f32
    %405 = vector.broadcast %cst_125 : f32 to vector<1x256xf32>
    %406 = arith.select %36, %404, %405 : vector<1x256xi1>, vector<1x256xf32>
    %407 = vector.broadcast %403 : f32 to vector<1x256xf32>
    %408 = arith.mulf %407, %406 : vector<1x256xf32>
    %409 = arith.addf %402, %408 : vector<1x256xf32>
    %c54 = arith.constant 54 : index
    %410 = memref.load %arg1[%c54] : memref<98xf32, #tpu.memory_space<smem>>
    %c0_126 = arith.constant 0 : index
    %c82_127 = arith.constant 82 : index
    %411 = vector.load %arg7[%c0_126, %c82_127] : memref<1x512xf32, #tpu.memory_space<vmem>>, vector<1x256xf32>
    %cst_128 = arith.constant 0.000000e+00 : f32
    %412 = vector.broadcast %cst_128 : f32 to vector<1x256xf32>
    %413 = arith.select %41, %411, %412 : vector<1x256xi1>, vector<1x256xf32>
    %414 = vector.broadcast %410 : f32 to vector<1x256xf32>
    %415 = arith.mulf %414, %413 : vector<1x256xf32>
    %416 = arith.addf %409, %415 : vector<1x256xf32>
    %c55 = arith.constant 55 : index
    %417 = memref.load %arg1[%c55] : memref<98xf32, #tpu.memory_space<smem>>
    %c0_129 = arith.constant 0 : index
    %c83_130 = arith.constant 83 : index
    %418 = vector.load %arg7[%c0_129, %c83_130] : memref<1x512xf32, #tpu.memory_space<vmem>>, vector<1x256xf32>
    %cst_131 = arith.constant 0.000000e+00 : f32
    %419 = vector.broadcast %cst_131 : f32 to vector<1x256xf32>
    %420 = arith.select %46, %418, %419 : vector<1x256xi1>, vector<1x256xf32>
    %421 = vector.broadcast %417 : f32 to vector<1x256xf32>
    %422 = arith.mulf %421, %420 : vector<1x256xf32>
    %423 = arith.addf %416, %422 : vector<1x256xf32>
    %c56 = arith.constant 56 : index
    %424 = memref.load %arg1[%c56] : memref<98xf32, #tpu.memory_space<smem>>
    %c0_132 = arith.constant 0 : index
    %c93_133 = arith.constant 93 : index
    %425 = vector.load %arg7[%c0_132, %c93_133] : memref<1x512xf32, #tpu.memory_space<vmem>>, vector<1x256xf32>
    %cst_134 = arith.constant 0.000000e+00 : f32
    %426 = vector.broadcast %cst_134 : f32 to vector<1x256xf32>
    %427 = arith.select %21, %425, %426 : vector<1x256xi1>, vector<1x256xf32>
    %428 = vector.broadcast %424 : f32 to vector<1x256xf32>
    %429 = arith.mulf %428, %427 : vector<1x256xf32>
    %430 = arith.addf %423, %429 : vector<1x256xf32>
    %c57 = arith.constant 57 : index
    %431 = memref.load %arg1[%c57] : memref<98xf32, #tpu.memory_space<smem>>
    %c0_135 = arith.constant 0 : index
    %c94_136 = arith.constant 94 : index
    %432 = vector.load %arg7[%c0_135, %c94_136] : memref<1x512xf32, #tpu.memory_space<vmem>>, vector<1x256xf32>
    %cst_137 = arith.constant 0.000000e+00 : f32
    %433 = vector.broadcast %cst_137 : f32 to vector<1x256xf32>
    %434 = arith.select %26, %432, %433 : vector<1x256xi1>, vector<1x256xf32>
    %435 = vector.broadcast %431 : f32 to vector<1x256xf32>
    %436 = arith.mulf %435, %434 : vector<1x256xf32>
    %437 = arith.addf %430, %436 : vector<1x256xf32>
    %c58 = arith.constant 58 : index
    %438 = memref.load %arg1[%c58] : memref<98xf32, #tpu.memory_space<smem>>
    %c0_138 = arith.constant 0 : index
    %c95_139 = arith.constant 95 : index
    %439 = vector.load %arg7[%c0_138, %c95_139] : memref<1x512xf32, #tpu.memory_space<vmem>>, vector<1x256xf32>
    %cst_140 = arith.constant 0.000000e+00 : f32
    %440 = vector.broadcast %cst_140 : f32 to vector<1x256xf32>
    %441 = arith.select %31, %439, %440 : vector<1x256xi1>, vector<1x256xf32>
    %442 = vector.broadcast %438 : f32 to vector<1x256xf32>
    %443 = arith.mulf %442, %441 : vector<1x256xf32>
    %444 = arith.addf %437, %443 : vector<1x256xf32>
    %c59 = arith.constant 59 : index
    %445 = memref.load %arg1[%c59] : memref<98xf32, #tpu.memory_space<smem>>
    %c0_141 = arith.constant 0 : index
    %c96_142 = arith.constant 96 : index
    %446 = vector.load %arg7[%c0_141, %c96_142] : memref<1x512xf32, #tpu.memory_space<vmem>>, vector<1x256xf32>
    %447 = vector.broadcast %445 : f32 to vector<1x256xf32>
    %448 = arith.mulf %447, %446 : vector<1x256xf32>
    %449 = arith.addf %444, %448 : vector<1x256xf32>
    %c60 = arith.constant 60 : index
    %450 = memref.load %arg1[%c60] : memref<98xf32, #tpu.memory_space<smem>>
    %c0_143 = arith.constant 0 : index
    %c97_144 = arith.constant 97 : index
    %451 = vector.load %arg7[%c0_143, %c97_144] : memref<1x512xf32, #tpu.memory_space<vmem>>, vector<1x256xf32>
    %cst_145 = arith.constant 0.000000e+00 : f32
    %452 = vector.broadcast %cst_145 : f32 to vector<1x256xf32>
    %453 = arith.select %36, %451, %452 : vector<1x256xi1>, vector<1x256xf32>
    %454 = vector.broadcast %450 : f32 to vector<1x256xf32>
    %455 = arith.mulf %454, %453 : vector<1x256xf32>
    %456 = arith.addf %449, %455 : vector<1x256xf32>
    %c61 = arith.constant 61 : index
    %457 = memref.load %arg1[%c61] : memref<98xf32, #tpu.memory_space<smem>>
    %c0_146 = arith.constant 0 : index
    %c98_147 = arith.constant 98 : index
    %458 = vector.load %arg7[%c0_146, %c98_147] : memref<1x512xf32, #tpu.memory_space<vmem>>, vector<1x256xf32>
    %cst_148 = arith.constant 0.000000e+00 : f32
    %459 = vector.broadcast %cst_148 : f32 to vector<1x256xf32>
    %460 = arith.select %41, %458, %459 : vector<1x256xi1>, vector<1x256xf32>
    %461 = vector.broadcast %457 : f32 to vector<1x256xf32>
    %462 = arith.mulf %461, %460 : vector<1x256xf32>
    %463 = arith.addf %456, %462 : vector<1x256xf32>
    %c62 = arith.constant 62 : index
    %464 = memref.load %arg1[%c62] : memref<98xf32, #tpu.memory_space<smem>>
    %c0_149 = arith.constant 0 : index
    %c99_150 = arith.constant 99 : index
    %465 = vector.load %arg7[%c0_149, %c99_150] : memref<1x512xf32, #tpu.memory_space<vmem>>, vector<1x256xf32>
    %cst_151 = arith.constant 0.000000e+00 : f32
    %466 = vector.broadcast %cst_151 : f32 to vector<1x256xf32>
    %467 = arith.select %46, %465, %466 : vector<1x256xi1>, vector<1x256xf32>
    %468 = vector.broadcast %464 : f32 to vector<1x256xf32>
    %469 = arith.mulf %468, %467 : vector<1x256xf32>
    %470 = arith.addf %463, %469 : vector<1x256xf32>
    %c63 = arith.constant 63 : index
    %471 = memref.load %arg1[%c63] : memref<98xf32, #tpu.memory_space<smem>>
    %c0_152 = arith.constant 0 : index
    %c109_153 = arith.constant 109 : index
    %472 = vector.load %arg7[%c0_152, %c109_153] : memref<1x512xf32, #tpu.memory_space<vmem>>, vector<1x256xf32>
    %cst_154 = arith.constant 0.000000e+00 : f32
    %473 = vector.broadcast %cst_154 : f32 to vector<1x256xf32>
    %474 = arith.select %21, %472, %473 : vector<1x256xi1>, vector<1x256xf32>
    %475 = vector.broadcast %471 : f32 to vector<1x256xf32>
    %476 = arith.mulf %475, %474 : vector<1x256xf32>
    %477 = arith.addf %470, %476 : vector<1x256xf32>
    %c64 = arith.constant 64 : index
    %478 = memref.load %arg1[%c64] : memref<98xf32, #tpu.memory_space<smem>>
    %c0_155 = arith.constant 0 : index
    %c110_156 = arith.constant 110 : index
    %479 = vector.load %arg7[%c0_155, %c110_156] : memref<1x512xf32, #tpu.memory_space<vmem>>, vector<1x256xf32>
    %cst_157 = arith.constant 0.000000e+00 : f32
    %480 = vector.broadcast %cst_157 : f32 to vector<1x256xf32>
    %481 = arith.select %26, %479, %480 : vector<1x256xi1>, vector<1x256xf32>
    %482 = vector.broadcast %478 : f32 to vector<1x256xf32>
    %483 = arith.mulf %482, %481 : vector<1x256xf32>
    %484 = arith.addf %477, %483 : vector<1x256xf32>
    %c65 = arith.constant 65 : index
    %485 = memref.load %arg1[%c65] : memref<98xf32, #tpu.memory_space<smem>>
    %c0_158 = arith.constant 0 : index
    %c111_159 = arith.constant 111 : index
    %486 = vector.load %arg7[%c0_158, %c111_159] : memref<1x512xf32, #tpu.memory_space<vmem>>, vector<1x256xf32>
    %cst_160 = arith.constant 0.000000e+00 : f32
    %487 = vector.broadcast %cst_160 : f32 to vector<1x256xf32>
    %488 = arith.select %31, %486, %487 : vector<1x256xi1>, vector<1x256xf32>
    %489 = vector.broadcast %485 : f32 to vector<1x256xf32>
    %490 = arith.mulf %489, %488 : vector<1x256xf32>
    %491 = arith.addf %484, %490 : vector<1x256xf32>
    %c66 = arith.constant 66 : index
    %492 = memref.load %arg1[%c66] : memref<98xf32, #tpu.memory_space<smem>>
    %c0_161 = arith.constant 0 : index
    %c112_162 = arith.constant 112 : index
    %493 = vector.load %arg7[%c0_161, %c112_162] : memref<1x512xf32, #tpu.memory_space<vmem>>, vector<1x256xf32>
    %494 = vector.broadcast %492 : f32 to vector<1x256xf32>
    %495 = arith.mulf %494, %493 : vector<1x256xf32>
    %496 = arith.addf %491, %495 : vector<1x256xf32>
    %c67 = arith.constant 67 : index
    %497 = memref.load %arg1[%c67] : memref<98xf32, #tpu.memory_space<smem>>
    %c0_163 = arith.constant 0 : index
    %c113_164 = arith.constant 113 : index
    %498 = vector.load %arg7[%c0_163, %c113_164] : memref<1x512xf32, #tpu.memory_space<vmem>>, vector<1x256xf32>
    %cst_165 = arith.constant 0.000000e+00 : f32
    %499 = vector.broadcast %cst_165 : f32 to vector<1x256xf32>
    %500 = arith.select %36, %498, %499 : vector<1x256xi1>, vector<1x256xf32>
    %501 = vector.broadcast %497 : f32 to vector<1x256xf32>
    %502 = arith.mulf %501, %500 : vector<1x256xf32>
    %503 = arith.addf %496, %502 : vector<1x256xf32>
    %c68 = arith.constant 68 : index
    %504 = memref.load %arg1[%c68] : memref<98xf32, #tpu.memory_space<smem>>
    %c0_166 = arith.constant 0 : index
    %c114_167 = arith.constant 114 : index
    %505 = vector.load %arg7[%c0_166, %c114_167] : memref<1x512xf32, #tpu.memory_space<vmem>>, vector<1x256xf32>
    %cst_168 = arith.constant 0.000000e+00 : f32
    %506 = vector.broadcast %cst_168 : f32 to vector<1x256xf32>
    %507 = arith.select %41, %505, %506 : vector<1x256xi1>, vector<1x256xf32>
    %508 = vector.broadcast %504 : f32 to vector<1x256xf32>
    %509 = arith.mulf %508, %507 : vector<1x256xf32>
    %510 = arith.addf %503, %509 : vector<1x256xf32>
    %c69 = arith.constant 69 : index
    %511 = memref.load %arg1[%c69] : memref<98xf32, #tpu.memory_space<smem>>
    %c0_169 = arith.constant 0 : index
    %c115_170 = arith.constant 115 : index
    %512 = vector.load %arg7[%c0_169, %c115_170] : memref<1x512xf32, #tpu.memory_space<vmem>>, vector<1x256xf32>
    %cst_171 = arith.constant 0.000000e+00 : f32
    %513 = vector.broadcast %cst_171 : f32 to vector<1x256xf32>
    %514 = arith.select %46, %512, %513 : vector<1x256xi1>, vector<1x256xf32>
    %515 = vector.broadcast %511 : f32 to vector<1x256xf32>
    %516 = arith.mulf %515, %514 : vector<1x256xf32>
    %517 = arith.addf %510, %516 : vector<1x256xf32>
    %c70 = arith.constant 70 : index
    %518 = memref.load %arg1[%c70] : memref<98xf32, #tpu.memory_space<smem>>
    %c0_172 = arith.constant 0 : index
    %c125_173 = arith.constant 125 : index
    %519 = vector.load %arg7[%c0_172, %c125_173] : memref<1x512xf32, #tpu.memory_space<vmem>>, vector<1x256xf32>
    %cst_174 = arith.constant 0.000000e+00 : f32
    %520 = vector.broadcast %cst_174 : f32 to vector<1x256xf32>
    %521 = arith.select %21, %519, %520 : vector<1x256xi1>, vector<1x256xf32>
    %522 = vector.broadcast %518 : f32 to vector<1x256xf32>
    %523 = arith.mulf %522, %521 : vector<1x256xf32>
    %524 = arith.addf %517, %523 : vector<1x256xf32>
    %c71 = arith.constant 71 : index
    %525 = memref.load %arg1[%c71] : memref<98xf32, #tpu.memory_space<smem>>
    %c0_175 = arith.constant 0 : index
    %c126_176 = arith.constant 126 : index
    %526 = vector.load %arg7[%c0_175, %c126_176] : memref<1x512xf32, #tpu.memory_space<vmem>>, vector<1x256xf32>
    %cst_177 = arith.constant 0.000000e+00 : f32
    %527 = vector.broadcast %cst_177 : f32 to vector<1x256xf32>
    %528 = arith.select %26, %526, %527 : vector<1x256xi1>, vector<1x256xf32>
    %529 = vector.broadcast %525 : f32 to vector<1x256xf32>
    %530 = arith.mulf %529, %528 : vector<1x256xf32>
    %531 = arith.addf %524, %530 : vector<1x256xf32>
    %c72 = arith.constant 72 : index
    %532 = memref.load %arg1[%c72] : memref<98xf32, #tpu.memory_space<smem>>
    %c0_178 = arith.constant 0 : index
    %c127_179 = arith.constant 127 : index
    %533 = vector.load %arg7[%c0_178, %c127_179] : memref<1x512xf32, #tpu.memory_space<vmem>>, vector<1x256xf32>
    %cst_180 = arith.constant 0.000000e+00 : f32
    %534 = vector.broadcast %cst_180 : f32 to vector<1x256xf32>
    %535 = arith.select %31, %533, %534 : vector<1x256xi1>, vector<1x256xf32>
    %536 = vector.broadcast %532 : f32 to vector<1x256xf32>
    %537 = arith.mulf %536, %535 : vector<1x256xf32>
    %538 = arith.addf %531, %537 : vector<1x256xf32>
    %c73 = arith.constant 73 : index
    %539 = memref.load %arg1[%c73] : memref<98xf32, #tpu.memory_space<smem>>
    %c0_181 = arith.constant 0 : index
    %c128_182 = arith.constant 128 : index
    %540 = vector.load %arg7[%c0_181, %c128_182] : memref<1x512xf32, #tpu.memory_space<vmem>>, vector<1x256xf32>
    %541 = vector.broadcast %539 : f32 to vector<1x256xf32>
    %542 = arith.mulf %541, %540 : vector<1x256xf32>
    %543 = arith.addf %538, %542 : vector<1x256xf32>
    %c74 = arith.constant 74 : index
    %544 = memref.load %arg1[%c74] : memref<98xf32, #tpu.memory_space<smem>>
    %c0_183 = arith.constant 0 : index
    %c129_184 = arith.constant 129 : index
    %545 = vector.load %arg7[%c0_183, %c129_184] : memref<1x512xf32, #tpu.memory_space<vmem>>, vector<1x256xf32>
    %cst_185 = arith.constant 0.000000e+00 : f32
    %546 = vector.broadcast %cst_185 : f32 to vector<1x256xf32>
    %547 = arith.select %36, %545, %546 : vector<1x256xi1>, vector<1x256xf32>
    %548 = vector.broadcast %544 : f32 to vector<1x256xf32>
    %549 = arith.mulf %548, %547 : vector<1x256xf32>
    %550 = arith.addf %543, %549 : vector<1x256xf32>
    %c75 = arith.constant 75 : index
    %551 = memref.load %arg1[%c75] : memref<98xf32, #tpu.memory_space<smem>>
    %c0_186 = arith.constant 0 : index
    %c130_187 = arith.constant 130 : index
    %552 = vector.load %arg7[%c0_186, %c130_187] : memref<1x512xf32, #tpu.memory_space<vmem>>, vector<1x256xf32>
    %cst_188 = arith.constant 0.000000e+00 : f32
    %553 = vector.broadcast %cst_188 : f32 to vector<1x256xf32>
    %554 = arith.select %41, %552, %553 : vector<1x256xi1>, vector<1x256xf32>
    %555 = vector.broadcast %551 : f32 to vector<1x256xf32>
    %556 = arith.mulf %555, %554 : vector<1x256xf32>
    %557 = arith.addf %550, %556 : vector<1x256xf32>
    %c76 = arith.constant 76 : index
    %558 = memref.load %arg1[%c76] : memref<98xf32, #tpu.memory_space<smem>>
    %c0_189 = arith.constant 0 : index
    %c131_190 = arith.constant 131 : index
    %559 = vector.load %arg7[%c0_189, %c131_190] : memref<1x512xf32, #tpu.memory_space<vmem>>, vector<1x256xf32>
    %cst_191 = arith.constant 0.000000e+00 : f32
    %560 = vector.broadcast %cst_191 : f32 to vector<1x256xf32>
    %561 = arith.select %46, %559, %560 : vector<1x256xi1>, vector<1x256xf32>
    %562 = vector.broadcast %558 : f32 to vector<1x256xf32>
    %563 = arith.mulf %562, %561 : vector<1x256xf32>
    %564 = arith.addf %557, %563 : vector<1x256xf32>
    %c77_192 = arith.constant 77 : index
    %565 = memref.load %arg1[%c77_192] : memref<98xf32, #tpu.memory_space<smem>>
    %c0_193 = arith.constant 0 : index
    %c141_194 = arith.constant 141 : index
    %566 = vector.load %arg7[%c0_193, %c141_194] : memref<1x512xf32, #tpu.memory_space<vmem>>, vector<1x256xf32>
    %cst_195 = arith.constant 0.000000e+00 : f32
    %567 = vector.broadcast %cst_195 : f32 to vector<1x256xf32>
    %568 = arith.select %21, %566, %567 : vector<1x256xi1>, vector<1x256xf32>
    %569 = vector.broadcast %565 : f32 to vector<1x256xf32>
    %570 = arith.mulf %569, %568 : vector<1x256xf32>
    %571 = arith.addf %564, %570 : vector<1x256xf32>
    %c78_196 = arith.constant 78 : index
    %572 = memref.load %arg1[%c78_196] : memref<98xf32, #tpu.memory_space<smem>>
    %c0_197 = arith.constant 0 : index
    %c142_198 = arith.constant 142 : index
    %573 = vector.load %arg7[%c0_197, %c142_198] : memref<1x512xf32, #tpu.memory_space<vmem>>, vector<1x256xf32>
    %cst_199 = arith.constant 0.000000e+00 : f32
    %574 = vector.broadcast %cst_199 : f32 to vector<1x256xf32>
    %575 = arith.select %26, %573, %574 : vector<1x256xi1>, vector<1x256xf32>
    %576 = vector.broadcast %572 : f32 to vector<1x256xf32>
    %577 = arith.mulf %576, %575 : vector<1x256xf32>
    %578 = arith.addf %571, %577 : vector<1x256xf32>
    %c79_200 = arith.constant 79 : index
    %579 = memref.load %arg1[%c79_200] : memref<98xf32, #tpu.memory_space<smem>>
    %c0_201 = arith.constant 0 : index
    %c143_202 = arith.constant 143 : index
    %580 = vector.load %arg7[%c0_201, %c143_202] : memref<1x512xf32, #tpu.memory_space<vmem>>, vector<1x256xf32>
    %cst_203 = arith.constant 0.000000e+00 : f32
    %581 = vector.broadcast %cst_203 : f32 to vector<1x256xf32>
    %582 = arith.select %31, %580, %581 : vector<1x256xi1>, vector<1x256xf32>
    %583 = vector.broadcast %579 : f32 to vector<1x256xf32>
    %584 = arith.mulf %583, %582 : vector<1x256xf32>
    %585 = arith.addf %578, %584 : vector<1x256xf32>
    %c80_204 = arith.constant 80 : index
    %586 = memref.load %arg1[%c80_204] : memref<98xf32, #tpu.memory_space<smem>>
    %c0_205 = arith.constant 0 : index
    %c144_206 = arith.constant 144 : index
    %587 = vector.load %arg7[%c0_205, %c144_206] : memref<1x512xf32, #tpu.memory_space<vmem>>, vector<1x256xf32>
    %588 = vector.broadcast %586 : f32 to vector<1x256xf32>
    %589 = arith.mulf %588, %587 : vector<1x256xf32>
    %590 = arith.addf %585, %589 : vector<1x256xf32>
    %c81_207 = arith.constant 81 : index
    %591 = memref.load %arg1[%c81_207] : memref<98xf32, #tpu.memory_space<smem>>
    %c0_208 = arith.constant 0 : index
    %c145_209 = arith.constant 145 : index
    %592 = vector.load %arg7[%c0_208, %c145_209] : memref<1x512xf32, #tpu.memory_space<vmem>>, vector<1x256xf32>
    %cst_210 = arith.constant 0.000000e+00 : f32
    %593 = vector.broadcast %cst_210 : f32 to vector<1x256xf32>
    %594 = arith.select %36, %592, %593 : vector<1x256xi1>, vector<1x256xf32>
    %595 = vector.broadcast %591 : f32 to vector<1x256xf32>
    %596 = arith.mulf %595, %594 : vector<1x256xf32>
    %597 = arith.addf %590, %596 : vector<1x256xf32>
    %c82_211 = arith.constant 82 : index
    %598 = memref.load %arg1[%c82_211] : memref<98xf32, #tpu.memory_space<smem>>
    %c0_212 = arith.constant 0 : index
    %c146_213 = arith.constant 146 : index
    %599 = vector.load %arg7[%c0_212, %c146_213] : memref<1x512xf32, #tpu.memory_space<vmem>>, vector<1x256xf32>
    %cst_214 = arith.constant 0.000000e+00 : f32
    %600 = vector.broadcast %cst_214 : f32 to vector<1x256xf32>
    %601 = arith.select %41, %599, %600 : vector<1x256xi1>, vector<1x256xf32>
    %602 = vector.broadcast %598 : f32 to vector<1x256xf32>
    %603 = arith.mulf %602, %601 : vector<1x256xf32>
    %604 = arith.addf %597, %603 : vector<1x256xf32>
    %c83_215 = arith.constant 83 : index
    %605 = memref.load %arg1[%c83_215] : memref<98xf32, #tpu.memory_space<smem>>
    %c0_216 = arith.constant 0 : index
    %c147_217 = arith.constant 147 : index
    %606 = vector.load %arg7[%c0_216, %c147_217] : memref<1x512xf32, #tpu.memory_space<vmem>>, vector<1x256xf32>
    %cst_218 = arith.constant 0.000000e+00 : f32
    %607 = vector.broadcast %cst_218 : f32 to vector<1x256xf32>
    %608 = arith.select %46, %606, %607 : vector<1x256xi1>, vector<1x256xf32>
    %609 = vector.broadcast %605 : f32 to vector<1x256xf32>
    %610 = arith.mulf %609, %608 : vector<1x256xf32>
    %611 = arith.addf %604, %610 : vector<1x256xf32>
    %c84 = arith.constant 84 : index
    %612 = memref.load %arg1[%c84] : memref<98xf32, #tpu.memory_space<smem>>
    %c0_219 = arith.constant 0 : index
    %c157_220 = arith.constant 157 : index
    %613 = vector.load %arg7[%c0_219, %c157_220] : memref<1x512xf32, #tpu.memory_space<vmem>>, vector<1x256xf32>
    %cst_221 = arith.constant 0.000000e+00 : f32
    %614 = vector.broadcast %cst_221 : f32 to vector<1x256xf32>
    %615 = arith.select %21, %613, %614 : vector<1x256xi1>, vector<1x256xf32>
    %616 = vector.broadcast %612 : f32 to vector<1x256xf32>
    %617 = arith.mulf %616, %615 : vector<1x256xf32>
    %618 = arith.addf %611, %617 : vector<1x256xf32>
    %c85 = arith.constant 85 : index
    %619 = memref.load %arg1[%c85] : memref<98xf32, #tpu.memory_space<smem>>
    %c0_222 = arith.constant 0 : index
    %c158_223 = arith.constant 158 : index
    %620 = vector.load %arg7[%c0_222, %c158_223] : memref<1x512xf32, #tpu.memory_space<vmem>>, vector<1x256xf32>
    %cst_224 = arith.constant 0.000000e+00 : f32
    %621 = vector.broadcast %cst_224 : f32 to vector<1x256xf32>
    %622 = arith.select %26, %620, %621 : vector<1x256xi1>, vector<1x256xf32>
    %623 = vector.broadcast %619 : f32 to vector<1x256xf32>
    %624 = arith.mulf %623, %622 : vector<1x256xf32>
    %625 = arith.addf %618, %624 : vector<1x256xf32>
    %c86 = arith.constant 86 : index
    %626 = memref.load %arg1[%c86] : memref<98xf32, #tpu.memory_space<smem>>
    %c0_225 = arith.constant 0 : index
    %c159_226 = arith.constant 159 : index
    %627 = vector.load %arg7[%c0_225, %c159_226] : memref<1x512xf32, #tpu.memory_space<vmem>>, vector<1x256xf32>
    %cst_227 = arith.constant 0.000000e+00 : f32
    %628 = vector.broadcast %cst_227 : f32 to vector<1x256xf32>
    %629 = arith.select %31, %627, %628 : vector<1x256xi1>, vector<1x256xf32>
    %630 = vector.broadcast %626 : f32 to vector<1x256xf32>
    %631 = arith.mulf %630, %629 : vector<1x256xf32>
    %632 = arith.addf %625, %631 : vector<1x256xf32>
    %c87 = arith.constant 87 : index
    %633 = memref.load %arg1[%c87] : memref<98xf32, #tpu.memory_space<smem>>
    %c0_228 = arith.constant 0 : index
    %c160_229 = arith.constant 160 : index
    %634 = vector.load %arg7[%c0_228, %c160_229] : memref<1x512xf32, #tpu.memory_space<vmem>>, vector<1x256xf32>
    %635 = vector.broadcast %633 : f32 to vector<1x256xf32>
    %636 = arith.mulf %635, %634 : vector<1x256xf32>
    %637 = arith.addf %632, %636 : vector<1x256xf32>
    %c88 = arith.constant 88 : index
    %638 = memref.load %arg1[%c88] : memref<98xf32, #tpu.memory_space<smem>>
    %c0_230 = arith.constant 0 : index
    %c161_231 = arith.constant 161 : index
    %639 = vector.load %arg7[%c0_230, %c161_231] : memref<1x512xf32, #tpu.memory_space<vmem>>, vector<1x256xf32>
    %cst_232 = arith.constant 0.000000e+00 : f32
    %640 = vector.broadcast %cst_232 : f32 to vector<1x256xf32>
    %641 = arith.select %36, %639, %640 : vector<1x256xi1>, vector<1x256xf32>
    %642 = vector.broadcast %638 : f32 to vector<1x256xf32>
    %643 = arith.mulf %642, %641 : vector<1x256xf32>
    %644 = arith.addf %637, %643 : vector<1x256xf32>
    %c89 = arith.constant 89 : index
    %645 = memref.load %arg1[%c89] : memref<98xf32, #tpu.memory_space<smem>>
    %c0_233 = arith.constant 0 : index
    %c162_234 = arith.constant 162 : index
    %646 = vector.load %arg7[%c0_233, %c162_234] : memref<1x512xf32, #tpu.memory_space<vmem>>, vector<1x256xf32>
    %cst_235 = arith.constant 0.000000e+00 : f32
    %647 = vector.broadcast %cst_235 : f32 to vector<1x256xf32>
    %648 = arith.select %41, %646, %647 : vector<1x256xi1>, vector<1x256xf32>
    %649 = vector.broadcast %645 : f32 to vector<1x256xf32>
    %650 = arith.mulf %649, %648 : vector<1x256xf32>
    %651 = arith.addf %644, %650 : vector<1x256xf32>
    %c90 = arith.constant 90 : index
    %652 = memref.load %arg1[%c90] : memref<98xf32, #tpu.memory_space<smem>>
    %c0_236 = arith.constant 0 : index
    %c163_237 = arith.constant 163 : index
    %653 = vector.load %arg7[%c0_236, %c163_237] : memref<1x512xf32, #tpu.memory_space<vmem>>, vector<1x256xf32>
    %cst_238 = arith.constant 0.000000e+00 : f32
    %654 = vector.broadcast %cst_238 : f32 to vector<1x256xf32>
    %655 = arith.select %46, %653, %654 : vector<1x256xi1>, vector<1x256xf32>
    %656 = vector.broadcast %652 : f32 to vector<1x256xf32>
    %657 = arith.mulf %656, %655 : vector<1x256xf32>
    %658 = arith.addf %651, %657 : vector<1x256xf32>
    %c91 = arith.constant 91 : index
    %659 = memref.load %arg1[%c91] : memref<98xf32, #tpu.memory_space<smem>>
    %c0_239 = arith.constant 0 : index
    %c173_240 = arith.constant 173 : index
    %660 = vector.load %arg7[%c0_239, %c173_240] : memref<1x512xf32, #tpu.memory_space<vmem>>, vector<1x256xf32>
    %cst_241 = arith.constant 0.000000e+00 : f32
    %661 = vector.broadcast %cst_241 : f32 to vector<1x256xf32>
    %662 = arith.select %21, %660, %661 : vector<1x256xi1>, vector<1x256xf32>
    %663 = vector.broadcast %659 : f32 to vector<1x256xf32>
    %664 = arith.mulf %663, %662 : vector<1x256xf32>
    %665 = arith.addf %658, %664 : vector<1x256xf32>
    %c92 = arith.constant 92 : index
    %666 = memref.load %arg1[%c92] : memref<98xf32, #tpu.memory_space<smem>>
    %c0_242 = arith.constant 0 : index
    %c174_243 = arith.constant 174 : index
    %667 = vector.load %arg7[%c0_242, %c174_243] : memref<1x512xf32, #tpu.memory_space<vmem>>, vector<1x256xf32>
    %cst_244 = arith.constant 0.000000e+00 : f32
    %668 = vector.broadcast %cst_244 : f32 to vector<1x256xf32>
    %669 = arith.select %26, %667, %668 : vector<1x256xi1>, vector<1x256xf32>
    %670 = vector.broadcast %666 : f32 to vector<1x256xf32>
    %671 = arith.mulf %670, %669 : vector<1x256xf32>
    %672 = arith.addf %665, %671 : vector<1x256xf32>
    %c93_245 = arith.constant 93 : index
    %673 = memref.load %arg1[%c93_245] : memref<98xf32, #tpu.memory_space<smem>>
    %c0_246 = arith.constant 0 : index
    %c175_247 = arith.constant 175 : index
    %674 = vector.load %arg7[%c0_246, %c175_247] : memref<1x512xf32, #tpu.memory_space<vmem>>, vector<1x256xf32>
    %cst_248 = arith.constant 0.000000e+00 : f32
    %675 = vector.broadcast %cst_248 : f32 to vector<1x256xf32>
    %676 = arith.select %31, %674, %675 : vector<1x256xi1>, vector<1x256xf32>
    %677 = vector.broadcast %673 : f32 to vector<1x256xf32>
    %678 = arith.mulf %677, %676 : vector<1x256xf32>
    %679 = arith.addf %672, %678 : vector<1x256xf32>
    %c94_249 = arith.constant 94 : index
    %680 = memref.load %arg1[%c94_249] : memref<98xf32, #tpu.memory_space<smem>>
    %c0_250 = arith.constant 0 : index
    %c176_251 = arith.constant 176 : index
    %681 = vector.load %arg7[%c0_250, %c176_251] : memref<1x512xf32, #tpu.memory_space<vmem>>, vector<1x256xf32>
    %682 = vector.broadcast %680 : f32 to vector<1x256xf32>
    %683 = arith.mulf %682, %681 : vector<1x256xf32>
    %684 = arith.addf %679, %683 : vector<1x256xf32>
    %c95_252 = arith.constant 95 : index
    %685 = memref.load %arg1[%c95_252] : memref<98xf32, #tpu.memory_space<smem>>
    %c0_253 = arith.constant 0 : index
    %c177_254 = arith.constant 177 : index
    %686 = vector.load %arg7[%c0_253, %c177_254] : memref<1x512xf32, #tpu.memory_space<vmem>>, vector<1x256xf32>
    %cst_255 = arith.constant 0.000000e+00 : f32
    %687 = vector.broadcast %cst_255 : f32 to vector<1x256xf32>
    %688 = arith.select %36, %686, %687 : vector<1x256xi1>, vector<1x256xf32>
    %689 = vector.broadcast %685 : f32 to vector<1x256xf32>
    %690 = arith.mulf %689, %688 : vector<1x256xf32>
    %691 = arith.addf %684, %690 : vector<1x256xf32>
    %c96_256 = arith.constant 96 : index
    %692 = memref.load %arg1[%c96_256] : memref<98xf32, #tpu.memory_space<smem>>
    %c0_257 = arith.constant 0 : index
    %c178_258 = arith.constant 178 : index
    %693 = vector.load %arg7[%c0_257, %c178_258] : memref<1x512xf32, #tpu.memory_space<vmem>>, vector<1x256xf32>
    %cst_259 = arith.constant 0.000000e+00 : f32
    %694 = vector.broadcast %cst_259 : f32 to vector<1x256xf32>
    %695 = arith.select %41, %693, %694 : vector<1x256xi1>, vector<1x256xf32>
    %696 = vector.broadcast %692 : f32 to vector<1x256xf32>
    %697 = arith.mulf %696, %695 : vector<1x256xf32>
    %698 = arith.addf %691, %697 : vector<1x256xf32>
    %c97_260 = arith.constant 97 : index
    %699 = memref.load %arg1[%c97_260] : memref<98xf32, #tpu.memory_space<smem>>
    %c0_261 = arith.constant 0 : index
    %c179_262 = arith.constant 179 : index
    %700 = vector.load %arg7[%c0_261, %c179_262] : memref<1x512xf32, #tpu.memory_space<vmem>>, vector<1x256xf32>
    %cst_263 = arith.constant 0.000000e+00 : f32
    %701 = vector.broadcast %cst_263 : f32 to vector<1x256xf32>
    %702 = arith.select %46, %700, %701 : vector<1x256xi1>, vector<1x256xf32>
    %703 = vector.broadcast %699 : f32 to vector<1x256xf32>
    %704 = arith.mulf %703, %702 : vector<1x256xf32>
    %705 = arith.addf %698, %704 : vector<1x256xf32>
    %c0_264 = arith.constant 0 : index
    %706 = memref.load %arg2[%c0_264] : memref<2xf32, #tpu.memory_space<smem>>
    %707 = vector.broadcast %706 : f32 to vector<1x256xf32>
    %708 = arith.mulf %705, %707 : vector<1x256xf32>
    %c1_265 = arith.constant 1 : index
    %709 = memref.load %arg2[%c1_265] : memref<2xf32, #tpu.memory_space<smem>>
    %710 = vector.broadcast %709 : f32 to vector<1x256xf32>
    %711 = arith.addf %708, %710 : vector<1x256xf32>
    %712 = arith.negf %711 : vector<1x256xf32>
    %713 = math.exp %712 : vector<1x256xf32>
    %cst_266 = arith.constant 1.000000e+00 : f32
    %714 = vector.broadcast %cst_266 : f32 to vector<1x256xf32>
    %715 = arith.addf %714, %713 : vector<1x256xf32>
    %716 = arith.divf %714, %715 : vector<1x256xf32>
    %c0_267 = arith.constant 0 : index
    %c0_268 = arith.constant 0 : index
    %c0_269 = arith.constant 0 : index
    %717 = vector.load %arg4[%c0_267, %c0_268, %c0_269] : memref<1x4x256xf32, #tpu.memory_space<vmem>>, vector<1x4x256xf32>
    %718 = vector.shape_cast %717 : vector<1x4x256xf32> to vector<4x256xf32>
    %719 = vector.broadcast %716 : vector<1x256xf32> to vector<4x256xf32>
    %720 = arith.mulf %718, %719 : vector<4x256xf32>
    %c0_270 = arith.constant 0 : index
    %c0_271 = arith.constant 0 : index
    %c0_272 = arith.constant 0 : index
    %721 = vector.load %arg5[%c0_270, %c0_271, %c0_272] : memref<1x4x256xf32, #tpu.memory_space<vmem>>, vector<1x4x256xf32>
    %722 = vector.shape_cast %721 : vector<1x4x256xf32> to vector<4x256xf32>
    %723 = vector.shape_cast %720 : vector<4x256xf32> to vector<1x4x256xf32>
    tpu.vector_store %arg5[%c0_270, %c0_271, %c0_272], %723 {strides = array<i32>} : memref<1x4x256xf32, #tpu.memory_space<vmem>>, vector<1x4x256xf32>,
    return
  }
  func.func @transform_0(%arg0: i32) -> i32 {
    %c0_i32 = arith.constant 0 : i32
    %c0_i32_0 = arith.constant 0 : i32
    return %c0_i32 : i32
  }
  func.func @transform_1(%arg0: i32) -> i32 {
    %c0_i32 = arith.constant 0 : i32
    %c0_i32_0 = arith.constant 0 : i32
    return %c0_i32 : i32
  }
  func.func @transform_2(%arg0: i32) -> (i32, i32) {
    %c0_i32 = arith.constant 0 : i32
    %c0_i32_0 = arith.constant 0 : i32
    %c0_i32_1 = arith.constant 0 : i32
    return %c0_i32, %c0_i32_0 : i32, i32
  }
  func.func @transform_3(%arg0: i32) -> (i32, i32, i32) {
    %c0_i32 = arith.constant 0 : i32
    %c0_i32_0 = arith.constant 0 : i32
    %c0_i32_1 = arith.constant 0 : i32
    return %arg0, %c0_i32, %c0_i32_0 : i32, i32, i32
  }
  func.func @transform_4(%arg0: i32) -> (i32, i32, i32) {
    %c0_i32 = arith.constant 0 : i32
    %c0_i32_0 = arith.constant 0 : i32
    %c0_i32_1 = arith.constant 0 : i32
    return %arg0, %c0_i32, %c0_i32_0 : i32, i32, i32
  }
}

</mosaic_0001>

<bundles_post_ra>
// kernel: spatial_gate.1
= control target key start
LH: loop header
LB: loop body
LE: loop exit
PB: predicated region body
PF: predicated region fallthrough
CT: control target
= control target key end

     0   :  { %9 = vsyncpa [#allocation5], 0  ;;  %s2696_s0 = inlined_call_operand.vmem [shape: f32[98], index: 0, kind: input, shape index: {}]   ;;  %s2697_s1 = inlined_call_operand.vmem [shape: f32[2], index: 1, kind: input, shape index: {}]   ;;  %s2698_s2 = inlined_call_operand.vmem [shape: s32[1,256], index: 2, kind: input, shape index: {}]   ;;  %s2699_s3 = inlined_call_operand.vmem [shape: f32[2,4,256], index: 3, kind: input, shape index: {}]   ;;  %s2700_s4 = inlined_call_operand.vmem [shape: f32[2,4,256], index: 4, kind: output, shape index: {}]  }
   0x1   :  { %10 = vsyncpa [#allocation7], 0  ;;  %s1765_s15 = smov 0  }
   0x2 LB: > { %s1445_s16 = sadd.s32 4294967295, %s1687_s15   ;;  %p1447_p0 = scmp.ge.s32.totalorder %s1687_s15, 1  ;;  %s1687_s15 = sphi %s1765_s15, %s16_s15  }
   0x3   : > { %p136_p1 = scmp.lt.s32.totalorder %s1687_s15, 3  ;;  %s148_s19 = sshll.u32 %s2696_s0, 4  ;;  %s149_s19 = int_to_ptr.vmem [resolvable:$true] %s148_s19 }
   0x4   : > { %p1576_p3 = scmp.eq.s32.totalorder %s1445_s16, 0  ;;  %s158_s22 = sshll.u32 %s2697_s1, 4  ;;  %s159_s22 = int_to_ptr.vmem [resolvable:$true] %s158_s22 }
   0x5   : > { %p137_p2 = pnand %p1447_p0, %p136_p1  ;;  %s1689_s23 = smov [#allocation4]  }
   0x6   : > { %s1690_s24 = smov [#allocation6]  }
   0x7   : > { %p1569_p4 = pneg %p137_p2 }
   0x8   : > { %182 = sbr.rel (%p137_p2) target bundleno = 470 (0x1d6), region = 36 }
   0x9   : > { %p1570_p5 = pnand %p1576_p3, %p1569_p4 }
   0xb   : > { %1572 = dma.vmem_to_smem (!%p1570_p5), %s149_s19, 16, %s1689_s23, [#allocation5]  }
   0xc   : > { %1575 = dma.vmem_to_smem (!%p1570_p5), %s159_s22, 16, %s1690_s24, [#allocation7]  }
   0xd   : > { %1678 = dma.done.wait (%p1576_p3), [#allocation5], 16  }
   0xe   : > { %1680 = vsyncadd (%p1576_p3), [#allocation5], 4294967280 }
   0xf   : > { %1682 = dma.done.wait (%p1576_p3), [#allocation7], 16  }
  0x10   : > { %1684 = vsyncadd (%p1576_p3), [#allocation7], 4294967280 }
  0x11   : > { %194 = sfence }
  0x12   : > { %p215_p6 = scmp.lt.s32.totalorder %s1445_s16, 1  ;;  %v269_v0 = vlaneseq  ;;  %v1691_v1 = vmov 0.0   ;;  %vm2728_vm1 = vcmask 1043456   ;;  %vm278_vm2 = vcmask 1040384   ;;  %s1692_s29 = smov 49  }
  0x13   : > { %s1693_s30 = smov 51   ;;  %s1694_s5 = smov 47   ;;  %vm325_vm6 = vcmask 408576   ;;  %vm314_vm9 = vcmask 416768   ;;  %vm336_vm12 = vcmask 400384  }
  0x14   : > { %s2848_s16 = smov (!%p215_p6, %s1445_s16), 1  ;;  %vm271_vm0 = vcmp.lt.s32.totalorder %v269_v0, 512  ;;  %vm1797_vm3 = vcmp.lt.s32.totalorder %v269_v0, 256  ;;  %s1695_s6 = smov 35  }
  0x15   : > { %273 = vst.msk [vmem:[#allocation2] sm:$0xf] %vm271_vm0, %v1691_v1  ;;  %s2701_s25 = sshll.u32 %s2848_s16, 3  ;;  %s1696_s7 = smov 50  }
  0x16   : > { %274 = vst.msk [vmem:[#allocation3] sm:$0xf] %vm271_vm0, %v1691_v1  ;;  %s1792_s28 = scalar_lea.vmem %s2699_s3, %s2701_s25  ;;  %s1697_s8 = smov 46  }
  0x17   : > { %v225_v2 = vld [vmem:[%s1792_s28] sm:$0xff]  ;;  %s1698_s9 = smov 31   ;;  %s1699_s10 = smov 45  }
  0x18   : > { %227 = vst [vmem:[#allocation1] ss:$2 sm:$0xff] %v225_v2  ;;  %s1700_s11 = smov 34   ;;  %s1701_s12 = smov 29  }
  0x19   : > { %s1702_s13 = smov 33   ;;  %s1460_s14 = sld [smem:[#allocation4 + $0x3]] }
  0x1a   : > { %s1703_s17 = smov 19   ;;  %s1467_s18 = sld [smem:[#allocation4 + $0xa]] }
  0x1b   : > { %s2703_s19 = smov 17   ;;  %s1705_s20 = smov 30  }
  0x1c   : > { %s1474_s21 = sld [smem:[#allocation4 + $0x11]]  ;;  %s2702_s22 = smov 15  }
  0x1d   : > { %s1707_s23 = smov 18   ;;  %s1708_s24 = smov 48  }
  0x1e   : > { %s1709_s26 = smov 32   ;;  %s2704_s27 = smov 16  }
  0x1f   : > { %v228_v3 = vld.sshfl [vmem:[#allocation1] sm:$0xff pattern:$0x75316420]  ;;  %v229_v4 = vld.sshfl [vmem:[#allocation1 + $0x8] sm:$0xff pattern:$0x75316420]  ;;  %v344_v23 = vstv %s1460_s14 }
  0x20   : > { %v233_v5 = vsel %vm2728_vm1, %v228_v3, -inf  ;;  %v240_v6 = vsel %vm2728_vm1, %v229_v4, -inf  ;;  %247 = vst [vmem:[#allocation1] ss:$2 sm:$0xff] %v225_v2  ;;  %v421_v24 = vstv %s1467_s18  ;;  %s2706_s14 = smov 14   ;;  %s2705_s18 = smov 13  }
  0x21   : > { %v234_v7 = vrot.slane %v233_v5, 4  ;;  %v241_v8 = vrot.slane %v240_v6, 4  ;;  %s2721_s25 = smov 3  }
  0x22   : > { %v498_v27 = vstv %s1474_s21  ;;  %s2707_s21 = smov 1  }
  0x23   : > { %v235_v9 = vmax.f32 %v233_v5, %v234_v7  ;;  %v242_v10 = vmax.f32 %v240_v6, %v241_v8  ;;  %v1922_v7 = vld [vmem:[%s2698_s2] sm:$0x3] }
  0x24   : > { %vm293_vm4 = vcmp.ge.s32.totalorder %v1922_v7, 2  ;;  %vm294_vm5 = vcmp.lt.s32.totalorder %v1922_v7, 18  ;;  %vm290_vm7 = vcmp.ge.s32.totalorder %v1922_v7, 3  ;;  %vm291_vm8 = vcmp.lt.s32.totalorder %v1922_v7, 19 }
  0x25   : > { %v236_v11 = vrot.slane %v235_v9, 2  ;;  %v243_v12 = vrot.slane %v242_v10, 2  ;;  %vm1938_vm10 = vmand %vm293_vm4, %vm294_vm5  ;;  %vm296_vm11 = vcmp.ge.s32.totalorder %v1922_v7, 1  ;;  %vm297_vm14 = vcmp.lt.s32.totalorder %v1922_v7, 17 }
  0x26   : > { %vm1947_vm13 = vmand %vm290_vm7, %vm291_vm8  ;;  %vm299_vm15 = vcmp.ge.s32.totalorder %v1922_v7, 4294967295  ;;  %vm300_vm0 = vcmp.lt.s32.totalorder %v1922_v7, 15  ;;  %vm2729_vm5 = vcmask 375808   ;;  %vm302_vm7 = vcmp.ge.s32.totalorder %v1922_v7, 4294967294 }
  0x27   : > { %v237_v13 = vmax.f32 %v235_v9, %v236_v11  ;;  %v244_v14 = vmax.f32 %v242_v10, %v243_v12  ;;  %v249_v30 = vld.sshfl [vmem:[#allocation1 + $0x8] sm:$0xff pattern:$0x75316420]  ;;  %v248_v32 = vld.sshfl [vmem:[#allocation1] sm:$0xff pattern:$0x75316420]  ;;  %vm1985_vm4 = vmand %vm299_vm15, %vm300_vm0 }
  0x28   : > { %v259_v31 = vsel %vm2728_vm1, %v249_v30, 0.0  ;;  %v252_v34 = vsel %vm2728_vm1, %v248_v32, 0.0  ;;  %vm303_vm8 = vcmp.lt.s32.totalorder %v1922_v7, 14  ;;  %vm380_vm15 = vcmask 367616  }
  0x29   : > { %v238_v15 = vrot.slane %v237_v13, 1  ;;  %v245_v16 = vrot.slane %v244_v14, 1  ;;  %v260_v33 = vrot.slane %v259_v31, 4  ;;  %v253_v36 = vrot.slane %v252_v34, 4  ;;  %vm2024_vm0 = vmand %vm302_vm7, %vm303_vm8 }
  0x2a   : > { %vm350_vm1 = vcmask 392192   ;;  %vm2731_vm8 = vcmask 269312  }
  0x2b   : > { %v239_v17 = vmax.f32 %v237_v13, %v238_v15  ;;  %v246_v18 = vmax.f32 %v244_v14, %v245_v16  ;;  %v261_v37 = vadd.f32 %v260_v33, %v259_v31  ;;  %v254_v38 = vadd.f32 %v253_v36, %v252_v34 }
  0x2d   : > { %v277_v19 = vrot.slane %v246_v18, 7  ;;  %v262_v39 = vrot.slane %v261_v37, 2  ;;  %v255_v41 = vrot.slane %v254_v38, 2 }
  0x2f   : > { %v279_v21 = vsel %vm278_vm2, %v239_v17, %v277_v19  ;;  %v263_v42 = vadd.f32 %v262_v39, %v261_v37  ;;  %v256_v43 = vadd.f32 %v255_v41, %v254_v38 }
  0x30   : > { %283 = vst.msk [vmem:[#allocation2 + $0x1] sm:$0x3] %vm1797_vm3, %v279_v21 }
  0x31   : > { %v264_v44 = vrot.slane %v263_v42, 1  ;;  %v257_v45 = vrot.slane %v256_v43, 1 }
  0x33   : > { %v265_v46 = vadd.f32 %v264_v44, %v263_v42  ;;  %v258_v47 = vadd.f32 %v257_v45, %v256_v43 }
  0x35   : > { %v267_v48 = vmul.f32 0.25, %v265_v46  ;;  %v266_v49 = vmul.f32 0.25, %v258_v47 }
  0x37   : > { %v309_v22 = vld [vmem:[#allocation2] sm:$0x7]  ;;  %v286_v50 = vrot.slane %v267_v48, 7 }
  0x38   : > { %333 = vrot.lane.b32.xlu1 %v309_v22, %s1692_s29  ;;  %311 = vrot.lane.b32.xlu0 %v309_v22, %s1693_s30  ;;  %v345_v25 = vmul.f32 %v344_v23, %v309_v22  ;;  %v422_v26 = vmul.f32 %v421_v24, %v309_v22  ;;  %v499_v28 = vmul.f32 %v498_v27, %v309_v22  ;;  %v1828_v29 = vld [vmem:[#allocation2 + $0x1] sm:$0x7] }
  0x39   : > { %355 = vrot.lane.b32.xlu2 %v309_v22, %s1694_s5  ;;  %v287_v51 = vsel %vm278_vm2, %v266_v49, %v286_v50  ;;  %vm2730_vm2 = vcmask 384000  }
  0x3a   : > { %289 = vst.msk [vmem:[#allocation3 + $0x1] sm:$0x3] %vm1797_vm3, %v287_v51  ;;  %vm1979_vm3 = vmand %vm296_vm11, %vm297_vm14  ;;  %vm305_vm11 = vcmp.ge.s32.totalorder %v1922_v7, 4294967293  ;;  %vm306_vm14 = vcmp.lt.s32.totalorder %v1922_v7, 13 }
  0x3b   : > { %vm2037_vm7 = vmand %vm305_vm11, %vm306_vm14  ;;  %vm435_vm11 = vcmask 252928   ;;  %vm2734_vm14 = vcmask 244736  }
  0x40   : > { %388 = vrot.lane.b32.xlu1 %v309_v22, %s1695_s6  ;;  %322 = vrot.lane.b32.xlu0 %v309_v22, %s1696_s7 }
  0x41   : > { %366 = vrot.lane.b32.xlu2 %v309_v22, %s1697_s8  ;;  %v1897_v1 = vld [vmem:[#allocation3] sm:$0x7] }
  0x48   : > { %432 = vrot.lane.b32.xlu1 %v309_v22, %s1698_s9  ;;  %377 = vrot.lane.b32.xlu0 %v309_v22, %s1699_s10 }
  0x49   : > { %399 = vrot.lane.b32.xlu2 %v309_v22, %s1700_s11 }
  0x50   : > { %454 = vrot.lane.b32.xlu1 %v309_v22, %s1701_s12  ;;  %410 = vrot.lane.b32.xlu0 %v309_v22, %s1702_s13 }
  0x51   : > { %465 = vrot.lane.b32.xlu2 %v309_v22, %s1703_s17 }
  0x58   : > { %487 = vrot.lane.b32.xlu1 %v309_v22, %s2703_s19  ;;  %443 = vrot.lane.b32.xlu0 %v309_v22, %s1705_s20  ;;  %s2714_s19 = smov 127  }
  0x59   : > { %509 = vrot.lane.b32.xlu2 %v309_v22, %s2702_s22  ;;  %s2708_s22 = smov 2  }
  0x60   : > { %476 = vrot.lane.b32.xlu0 %v309_v22, %s1707_s23  ;;  %347 = vrot.lane.b32.xlu1 %v345_v25, %s1708_s24 }
  0x61   : > { %424 = vrot.lane.b32.xlu2 %v422_v26, %s1709_s26 }
  0x68   : > { %501 = vrot.lane.b32.xlu0 %v499_v28, %s2704_s27  ;;  %520 = vrot.lane.b32.xlu1 %v309_v22, %s2706_s14  ;;  %s2709_s27 = smov 126   ;;  %s2713_s14 = smov 125  }
  0x69   : > { %531 = vrot.lane.b32.xlu2 %v309_v22, %s2705_s18  ;;  %s1488_s18 = sld [smem:[#allocation4 + $0x1f]] }
  0x6f   : > { %v648_v35 = vstv %s1488_s18  ;;  %s2716_s18 = smov 110  }
  0x70   : > { %542 = vrot.lane.b32.xlu0 %v309_v22, %s2721_s25  ;;  %553 = vrot.lane.b32.xlu1 %v309_v22, %s2708_s22  ;;  %s2711_s22 = smov 114   ;;  %v649_v40 = vmul.f32 %v648_v35, %v1828_v29  ;;  %s2725_s25 = smov 83  }
  0x71   : > { %564 = vrot.lane.b32.xlu2 %v309_v22, %s2707_s21  ;;  %s2710_s21 = smov 115  }
  0x78   : > { %582 = vrot.lane.b32.xlu0 %v1828_v29, %s2714_s19  ;;  %593 = vrot.lane.b32.xlu1 %v1828_v29, %s2709_s27  ;;  %s2712_s27 = smov 113   ;;  %s2718_s19 = smov 99  }
  0x79   : > { %604 = vrot.lane.b32.xlu2 %v1828_v29, %s2713_s14  ;;  %s2717_s14 = smov 109  }
  0x80   : > { %615 = vrot.lane.b32.xlu0 %v1828_v29, %s2710_s21  ;;  %626 = vrot.lane.b32.xlu1 %v1828_v29, %s2711_s22  ;;  %s2720_s21 = smov 111   ;;  %s2715_s22 = smov 112  }
  0x81   : > { %637 = vrot.lane.b32.xlu2 %v1828_v29, %s2712_s27  ;;  %s1495_s27 = sld [smem:[#allocation4 + $0x26]] }
  0x87   : > { %v725_v52 = vstv %s1495_s27  ;;  %s2724_s27 = smov 94  }
  0x88   : > { %659 = vrot.lane.b32.xlu0 %v1828_v29, %s2720_s21  ;;  %651 = vrot.lane.b32.xlu1 %v649_v40, %s2715_s22  ;;  %s2719_s22 = smov 98   ;;  %v726_v54 = vmul.f32 %v725_v52, %v1828_v29  ;;  %s1502_s21 = sld [smem:[#allocation4 + $0x2d]] }
  0x89   : > { %670 = vrot.lane.b32.xlu2 %v1828_v29, %s2716_s18  ;;  %s1728_s18 = smov 97  }
  0x8e   : > { %v802_v57 = vstv %s1502_s21  ;;  %s1739_s21 = smov 77  }
  0x8f   : > { %v803_v61 = vmul.f32 %v802_v57, %v1828_v29 }
  0x90   : > { %681 = vrot.lane.b32.xlu0 %v1828_v29, %s2717_s14  ;;  %692 = vrot.lane.b32.xlu1 %v1828_v29, %s2718_s19  ;;  %s2722_s14 = smov 95   ;;  %s2723_s19 = smov 96  }
  0x91   : > { %703 = vrot.lane.b32.xlu2 %v1828_v29, %s2719_s22  ;;  %s1732_s22 = smov 93  }
  0x93   : > { %v1859_v53 = vpop.permute.xlu2 %355 }
  0x94   : > { %v357_v18 = vrot.slane %v1859_v53, 1 }
  0x96   : > { %v359_v31 = vsel %vm2730_vm2, %v1859_v53, %v357_v18  ;;  %vm2732_vm2 = vcmask 277504  }
  0x97   : > { %v361_v38 = vsel %vm1985_vm4, %v359_v31, 0.0 }
  0x98   : > { %714 = vrot.lane.b32.xlu0 %v1828_v29, %s1728_s18  ;;  %736 = vrot.lane.b32.xlu1 %v1828_v29, %s2722_s14  ;;  %s2726_s14 = smov 82  }
  0x99   : > { %728 = vrot.lane.b32.xlu2 %v726_v54, %s2723_s19  ;;  %s2727_s19 = smov 81  }
  0x9b   : > { %v1867_v55 = vpop.permute.xlu2 %366 }
  0x9c   : > { %v368_v32 = vrot.slane %v1867_v55, 1 }
  0x9e   : > { %v370_v41 = vsel %vm2729_vm5, %v1867_v55, %v368_v32  ;;  %vm2733_vm5 = vcmask 285696  }
  0x9f   : > { %v372_v55 = vsel %vm2024_vm0, %v370_v41, 0.0 }
  0xa0   : > { %747 = vrot.lane.b32.xlu0 %v1828_v29, %s2724_s27  ;;  %758 = vrot.lane.b32.xlu1 %v1828_v29, %s1732_s22  ;;  %s1736_s27 = smov 79  }
  0xa1   : > { %769 = vrot.lane.b32.xlu2 %v1828_v29, %s2725_s25  ;;  %s1737_s25 = smov 80  }
  0xa3   : > { %v1875_v56 = vpop.permute.xlu2 %399 }
  0xa4   : > { %v401_v45 = vrot.slane %v1875_v56, 1 }
  0xa8   : > { %780 = vrot.lane.b32.xlu0 %v1828_v29, %s2726_s14  ;;  %791 = vrot.lane.b32.xlu1 %v1828_v29, %s2727_s19  ;;  %s1738_s14 = smov 78   ;;  %s1509_s19 = sld [smem:[#allocation4 + $0x34]] }
  0xa9   : > { %813 = vrot.lane.b32.xlu2 %v1828_v29, %s1736_s27 }
  0xaa   : > { %v1883_v58 = vpop.permute.xlu1 %333  ;;  %v312_v59 = vpop.permute.xlu0 %311 }
  0xab   : > { %v1885_v60 = vpop.permute.xlu2 %465  ;;  %v313_v12 = vrot.slane %v312_v59, 1  ;;  %v335_v15 = vrot.slane %v1883_v58, 1 }
  0xad   : > { %v315_v17 = vsel %vm314_vm9, %v312_v59, %v313_v12  ;;  %v337_v28 = vsel %vm336_vm12, %v1883_v58, %v335_v15  ;;  %v403_v59 = vsel %vm2732_vm2, %v1875_v56, %v401_v45  ;;  %vm2735_vm2 = vcmask 154624  }
  0xae   : > { %v878_v2 = vstv %s1509_s19  ;;  %s1928_s19 = sld [smem:[#allocation4 + $0x3b]]  ;;  %v317_v25 = vsel %vm1947_vm13, %v315_v17, 0.0  ;;  %v339_v36 = vsel %vm1979_vm3, %v337_v28, 0.0  ;;  %v405_v12 = vsel %vm1938_vm10, %v403_v59, 0.0 }
  0xaf   : > { %v879_v6 = vmul.f32 %v878_v2, %v1897_v1 }
  0xb0   : > { %805 = vrot.lane.b32.xlu0 %v803_v61, %s1737_s25  ;;  %824 = vrot.lane.b32.xlu1 %v1828_v29, %s1738_s14 }
  0xb1   : > { %835 = vrot.lane.b32.xlu2 %v1828_v29, %s1739_s21 }
  0xb2   : > { %v1893_v62 = vpop.permute.xlu1 %388  ;;  %v323_v63 = vpop.permute.xlu0 %322 }
  0xb3   : > { %v1895_v0 = vpop.permute.xlu2 %509  ;;  %v324_v8 = vrot.slane %v323_v63, 1  ;;  %v390_v43 = vrot.slane %v1893_v62, 1 }
  0xb4   : > { %v948_v23 = vstv %s1928_s19  ;;  %s2782_s19 = smov 15  }
  0xb5   : > { %v326_v14 = vsel %vm325_vm6, %v323_v63, %v324_v8  ;;  %v949_v33 = vmul.f32 %v948_v23, %v1897_v1  ;;  %v392_v58 = vsel %vm2733_vm5, %v1893_v62, %v390_v43  ;;  %vm2739_vm5 = vcmask 261120  }
  0xb6   : > { %v328_v20 = vsel %vm1938_vm10, %v326_v14, 0.0  ;;  %v394_v56 = vsel %vm1947_vm13, %v392_v58, 0.0 }
  0xb8   : > { %848 = vrot.lane.b32.xlu0 %v1897_v1, %s1693_s30  ;;  %858 = vrot.lane.b32.xlu1 %v1897_v1, %s1696_s7  ;;  %s1915_s30 = sld [smem:[#allocation4 + $0x1]]  ;;  %s2781_s7 = smov 17  }
  0xb9   : > { %868 = vrot.lane.b32.xlu2 %v1897_v1, %s1692_s29  ;;  %s2106_s29 = sld [smem:[#allocation4 + $0xf]] }
  0xba   : > { %v1905_v3 = vpop.permute.xlu1 %432  ;;  %v1907_v4 = vpop.permute.xlu0 %377 }
  0xbb   : > { %v1909_v5 = vpop.permute.xlu2 %424  ;;  %v379_v40 = vrot.slane %v1907_v4, 1  ;;  %v434_v14 = vrot.slane %v1905_v3, 1 }
  0xbd   : > { %v381_v51 = vsel %vm380_vm15, %v1907_v4, %v379_v40  ;;  %v436_v32 = vsel %vm435_vm11, %v1905_v3, %v434_v14 }
  0xbe   : > { %v329_v19 = vstv %s1915_s30  ;;  %s2016_s30 = sld [smem:[#allocation4 + $0x8]]  ;;  %v383_v4 = vsel %vm2037_vm7, %v381_v51, 0.0  ;;  %v438_v40 = vsel %vm1985_vm4, %v436_v32, 0.0 }
  0xbf   : > { %v330_v29 = vmul.f32 %v329_v19, %v328_v20 }
  0xc0   : > { %888 = vrot.lane.b32.xlu0 %v1897_v1, %s1694_s5  ;;  %881 = vrot.lane.b32.xlu1 %v879_v6, %s1708_s24  ;;  %s1930_s5 = sld [smem:[#allocation4]] }
  0xc1   : > { %898 = vrot.lane.b32.xlu2 %v1897_v1, %s1697_s8  ;;  %s1943_s8 = sld [smem:[#allocation4 + $0x2]] }
  0xc2   : > { %v1924_v9 = vpop.permute.xlu1 %454  ;;  %v1926_v10 = vpop.permute.xlu0 %410  ;;  %s1952_s24 = sld [smem:[#allocation4 + $0x4]] }
  0xc3   : > { %v1934_v11 = vpop.permute.xlu2 %531  ;;  %v412_v61 = vrot.slane %v1926_v10, 1 }
  0xc4   : > { %v406_v8 = vstv %s2016_s30  ;;  %s2170_s30 = sld [smem:[#allocation4 + $0x15]] }
  0xc5   : > { %v414_v17 = vsel %vm2731_vm8, %v1926_v10, %v412_v61  ;;  %vm2738_vm8 = vcmask 236544  }
  0xc6   : > { %v318_v24 = vstv %s1930_s5  ;;  %v416_v10 = vsel %vm1979_vm3, %v414_v17, 0.0  ;;  %s2139_s5 = sld [smem:[#allocation4 + $0x12]] }
  0xc7   : > { %v319_v34 = vmul.f32 %v318_v24, %v317_v25  ;;  %v340_v35 = vstv %s1943_s8  ;;  %s2144_s8 = sld [smem:[#allocation4 + $0x13]] }
  0xc8   : > { %908 = vrot.lane.b32.xlu0 %v1897_v1, %s1699_s10  ;;  %918 = vrot.lane.b32.xlu1 %v1897_v1, %s1695_s6  ;;  %s1991_s6 = sld [smem:[#allocation4 + $0x5]]  ;;  %v362_v37 = vstv %s1952_s24  ;;  %v341_v42 = vmul.f32 %v340_v35, %v339_v36  ;;  %v426_v36 = vrot.slane %v1909_v5, 1  ;;  %s2783_s24 = smov 16  }
  0xc9   : > { %928 = vrot.lane.b32.xlu2 %v1897_v1, %s1700_s11  ;;  %s2000_s10 = sld [smem:[#allocation4 + $0x6]]  ;;  %v331_v39 = vadd.f32 %v330_v29, %v319_v34  ;;  %v363_v53 = vmul.f32 %v362_v37, %v361_v38  ;;  %v407_v29 = vmul.f32 %v406_v8, %v405_v12  ;;  %v467_v34 = vrot.slane %v1885_v60, 1 }
  0xca   : > { %v1967_v21 = vpop.permute.xlu1 %487  ;;  %v1969_v22 = vpop.permute.xlu0 %443  ;;  %s2005_s11 = sld [smem:[#allocation4 + $0x7]] }
  0xcb   : > { %v1975_v26 = vpop.permute.xlu2 %564  ;;  %v342_v52 = vadd.f32 %v341_v42, %v331_v39  ;;  %v445_v25 = vrot.slane %v1969_v22, 1  ;;  %v469_v42 = vsel %vm2735_vm2, %v1885_v60, %v467_v34  ;;  %vm2737_vm2 = vcmask 138240  }
  0xcd   : > { %v447_v38 = vsel %vm2734_vm14, %v1969_v22, %v445_v25  ;;  %vm2736_vm14 = vcmask 146432  }
  0xce   : > { %v373_v54 = vstv %s1991_s6  ;;  %s2784_s6 = smov 14  }
  0xcf   : > { %v384_v2 = vstv %s2000_s10  ;;  %v374_v6 = vmul.f32 %v373_v54, %v372_v55  ;;  %v489_v54 = vrot.slane %v1967_v21, 1  ;;  %s2785_s10 = smov 13  }
  0xd0   : > { %938 = vrot.lane.b32.xlu0 %v1897_v1, %s1702_s13  ;;  %958 = vrot.lane.b32.xlu1 %v1897_v1, %s1698_s9  ;;  %s2046_s9 = sld [smem:[#allocation4 + $0x9]]  ;;  %v395_v62 = vstv %s2005_s11  ;;  %v385_v15 = vmul.f32 %v384_v2, %v383_v4  ;;  %v471_v4 = vsel %vm1947_vm13, %v469_v42, 0.0 }
  0xd1   : > { %951 = vrot.lane.b32.xlu2 %v949_v33, %s1709_s26  ;;  %s2057_s13 = sld [smem:[#allocation4 + $0xb]]  ;;  %v396_v24 = vmul.f32 %v395_v62, %v394_v56  ;;  %v456_v33 = vrot.slane %v1924_v9, 1  ;;  %v511_v62 = vrot.slane %v1895_v0, 1 }
  0xd2   : > { %v2029_v46 = vpop.permute.xlu0 %476  ;;  %v348_v47 = vpop.permute.xlu1 %347  ;;  %s2069_s26 = sld [smem:[#allocation4 + $0x42]] }
  0xd3   : > { %v349_v48 = vrot.slane %v348_v47, 1  ;;  %v2031_v49 = vpop.permute.xlu2 %604  ;;  %v458_v22 = vsel %vm2738_vm8, %v1924_v9, %v456_v33  ;;  %v478_v43 = vrot.slane %v2029_v46, 1  ;;  %v428_v9 = vsel %vm2739_vm5, %v1909_v5, %v426_v36  ;;  %s2162_s11 = sld [smem:[#allocation4 + $0x14]] }
  0xd4   : > { %v460_v59 = vsel %vm2037_vm7, %v458_v22, 0.0  ;;  %vm2748_vm8 = vcmask 130048   ;;  %vm2742_vm5 = vcmask 105472   ;;  %v566_v22 = vrot.slane %v1975_v26, 1 }
  0xd5   : > { %v351_v57 = vsel %vm350_vm1, %v348_v47, %v349_v48 }
  0xd6   : > { %v353_v63 = vadd.f32 %v351_v57, %v342_v52  ;;  %v417_v31 = vstv %s2046_s9  ;;  %v449_v52 = vsel %vm2024_vm0, %v447_v38, 0.0  ;;  %s2175_s9 = sld [smem:[#allocation4 + $0x16]] }
  0xd7   : > { %v418_v37 = vmul.f32 %v417_v31, %v416_v10  ;;  %v439_v3 = vstv %s2057_s13  ;;  %v533_v10 = vrot.slane %v1934_v11, 1  ;;  %s2180_s13 = sld [smem:[#allocation4 + $0x17]] }
  0xd8   : > { %v364_v7 = vadd.f32 %v363_v53, %v353_v63  ;;  %968 = vrot.lane.b32.xlu0 %v1897_v1, %s1705_s20  ;;  %978 = vrot.lane.b32.xlu1 %v1897_v1, %s1701_s12  ;;  %s2080_s12 = sld [smem:[#allocation4 + $0xc]]  ;;  %v1018_v41 = vstv %s2069_s26  ;;  %v440_v60 = vmul.f32 %v439_v3, %v438_v40  ;;  %v480_v63 = vsel %vm2736_vm14, %v2029_v46, %v478_v43  ;;  %s2786_s26 = smov 3  }
  0xd9   : > { %988 = vrot.lane.b32.xlu2 %v1897_v1, %s1703_s17  ;;  %s2085_s17 = sld [smem:[#allocation4 + $0xd]]  ;;  %v1019_v57 = vmul.f32 %v1018_v41, %v1897_v1  ;;  %vm2740_vm14 = vcmask 121856   ;;  %v483_v46 = vstv %s2106_s29  ;;  %v482_v8 = vsel %vm1938_vm10, %v480_v63, 0.0 }
  0xda   : > { %v375_v18 = vadd.f32 %v374_v6, %v364_v7  ;;  %v2076_v19 = vpop.permute.xlu0 %501  ;;  %v2078_v20 = vpop.permute.xlu1 %520  ;;  %s2094_s20 = sld [smem:[#allocation4 + $0xe]]  ;;  %v491_v7 = vsel %vm2737_vm2, %v1967_v21, %v489_v54  ;;  %vm2741_vm2 = vcmask 113664   ;;  %v535_v3 = vsel %vm2742_vm5, %v1934_v11, %v533_v10 }
  0xdb   : > { %v2082_v23 = vpop.permute.xlu2 %637  ;;  %v522_v14 = vrot.slane %v2078_v20, 1  ;;  %v503_v32 = vrot.slane %v2076_v19, 1  ;;  %vm2745_vm5 = vcmask 7168   ;;  %s2224_s29 = sld [smem:[#allocation4 + $0x1a]] }
  0xdc   : > { %v386_v28 = vadd.f32 %v385_v15, %v375_v18 }
  0xde   : > { %v397_v35 = vadd.f32 %v396_v24, %v386_v28  ;;  %v450_v51 = vstv %s2080_s12  ;;  %v493_v24 = vsel %vm1979_vm3, %v491_v7, 0.0  ;;  %v513_v28 = vsel %vm2740_vm14, %v1895_v0, %v511_v62  ;;  %s2787_s12 = smov 2   ;;  %v575_v62 = vld [vmem:[#allocation2 + $0x1] sm:$0x3] }
  0xdf   : > { %v461_v58 = vstv %s2085_s17  ;;  %v451_v61 = vmul.f32 %v450_v51, %v449_v52  ;;  %v516_v0 = vstv %s2139_s5  ;;  %vm2744_vm14 = vcmask 23552   ;;  %s2195_s17 = sld [smem:[#allocation4 + $0x18]]  ;;  %s2790_s5 = smov 126  }
  0xe0   : > { %v408_v39 = vadd.f32 %v407_v29, %v397_v35  ;;  %998 = vrot.lane.b32.xlu0 %v1897_v1, %s1707_s23  ;;  %1008 = vrot.lane.b32.xlu1 %v1897_v1, %s2781_s7  ;;  %s2120_s23 = sld [smem:[#allocation4 + $0x10]]  ;;  %v472_v5 = vstv %s2094_s20  ;;  %v462_v6 = vmul.f32 %v461_v58, %v460_v59  ;;  %v484_v29 = vmul.f32 %v483_v46, %v482_v8  ;;  %s2788_s20 = smov 1   ;;  %v2217_v58 = vld [vmem:[#allocation3 + $0x1] sm:$0x7] }
  0xe1   : > { %1028 = vrot.lane.b32.xlu2 %v1897_v1, %s2782_s19  ;;  %v473_v12 = vmul.f32 %v472_v5, %v471_v4  ;;  %v524_v35 = vsel %vm2741_vm2, %v2078_v20, %v522_v14  ;;  %v505_v20 = vsel %vm2748_vm8, %v2076_v19, %v503_v32  ;;  %vm2743_vm2 = vcmask 15360   ;;  %s2215_s7 = sld [smem:[#allocation4 + $0x19]] }
  0xe2   : > { %v419_v45 = vadd.f32 %v418_v37, %v408_v39  ;;  %v2116_v47 = vpop.permute.xlu0 %542  ;;  %v2118_v48 = vpop.permute.xlu1 %553  ;;  %v515_v37 = vsel %vm1985_vm4, %v513_v28, 0.0  ;;  %v527_v39 = vstv %s2144_s8  ;;  %v526_v41 = vsel %vm2024_vm0, %v524_v35, 0.0  ;;  %s2229_s19 = sld [smem:[#allocation4 + $0x1b]] }
  0xe3   : > { %v2127_v53 = vpop.permute.xlu2 %670  ;;  %v544_v36 = vrot.slane %v2116_v47, 1  ;;  %v555_v40 = vrot.slane %v2118_v48, 1  ;;  %v517_v11 = vmul.f32 %v516_v0, %v515_v37  ;;  %v538_v51 = vstv %s2162_s11  ;;  %s2236_s8 = sld [smem:[#allocation4 + $0x50]] }
  0xe4   : > { %v430_v55 = vadd.f32 %v428_v9, %v419_v45  ;;  %v537_v52 = vsel %vm2037_vm7, %v535_v3, 0.0  ;;  %v528_v54 = vmul.f32 %v527_v39, %v526_v41  ;;  %v571_v5 = vstv %s2180_s13  ;;  %s2256_s11 = sld [smem:[#allocation4 + $0x1e]]  ;;  %s2793_s13 = smov 114  }
  0xe5   : > { %v546_v43 = vsel %vm2744_vm14, %v2116_v47, %v544_v36  ;;  %vm2747_vm14 = vcmask 1031168   ;;  %v600_v0 = vstv %s2224_s29  ;;  %v639_v37 = vrot.slane %v2082_v23, 1  ;;  %s2796_s29 = smov 112  }
  0xe6   : > { %v441_v2 = vadd.f32 %v440_v60, %v430_v55  ;;  %v494_v18 = vstv %s2120_s23  ;;  %v549_v55 = vstv %s2170_s30  ;;  %v548_v47 = vsel %vm1947_vm13, %v546_v43, 0.0  ;;  %s2789_s23 = smov 127   ;;  %s2266_s30 = sld [smem:[#allocation4 + $0x20]] }
  0xe7   : > { %v495_v33 = vmul.f32 %v494_v18, %v493_v24  ;;  %vm2750_vm8 = vcmask 924672  }
  0xe8   : > { %v452_v56 = vadd.f32 %v451_v61, %v441_v2  ;;  %1021 = vrot.lane.b32.xlu0 %v1019_v57, %s2783_s24  ;;  %1038 = vrot.lane.b32.xlu1 %v1897_v1, %s2784_s6  ;;  %v568_v57 = vsel %vm2745_vm5, %v1975_v26, %v566_v22  ;;  %v539_v61 = vmul.f32 %v538_v51, %v537_v52  ;;  %v560_v2 = vstv %s2175_s9  ;;  %s2791_s24 = smov 125   ;;  %s2245_s6 = sld [smem:[#allocation4 + $0x1c]] }
  0xe9   : > { %1048 = vrot.lane.b32.xlu2 %v1897_v1, %s2785_s10  ;;  %v570_v26 = vsel %vm1979_vm3, %v568_v57, 0.0  ;;  %vm2752_vm5 = vcmask 1022976   ;;  %s2251_s10 = sld [smem:[#allocation4 + $0x1d]]  ;;  %s2792_s9 = smov 115   ;;  %v641_v52 = vsel %vm2750_vm8, %v2082_v23, %v639_v37  ;;  %vm2754_vm8 = vcmask 900096  }
  0xea   : > { %v463_v21 = vadd.f32 %v462_v6, %v452_v56  ;;  %v2155_v15 = vpop.permute.xlu0 %582  ;;  %v2157_v17 = vpop.permute.xlu1 %593  ;;  %v550_v6 = vmul.f32 %v549_v55, %v548_v47  ;;  %v576_v56 = vstv %s2195_s17  ;;  %v572_v24 = vmul.f32 %v571_v5, %v570_v26  ;;  %s2295_s17 = sld [smem:[#allocation4 + $0x22]] }
  0xeb   : > { %v2164_v25 = vpop.permute.xlu2 %703  ;;  %v584_v63 = vrot.slane %v2155_v15, 1  ;;  %v595_v7 = vrot.slane %v2157_v17, 1 }
  0xec   : > { %v474_v31 = vadd.f32 %v473_v12, %v463_v21  ;;  %v606_v21 = vrot.slane %v2031_v49, 1  ;;  %v666_v26 = vstv %s2266_s30  ;;  %s2350_s30 = sld [smem:[#allocation4 + $0x28]] }
  0xed   : > { %v597_v10 = vsel %vm2747_vm14, %v2157_v17, %v595_v7  ;;  %vm2751_vm14 = vcmask 932864  }
  0xee   : > { %v485_v34 = vadd.f32 %v484_v29, %v474_v31  ;;  %v577_v31 = vmul.f32 %v576_v56, %v575_v62  ;;  %v608_v35 = vsel %vm2752_vm5, %v2031_v49, %v606_v21  ;;  %v599_v17 = vsel %vm2024_vm0, %v597_v10, 0.0 }
  0xef   : > { %v611_v49 = vstv %s2229_s19  ;;  %v601_v22 = vmul.f32 %v600_v0, %v599_v17  ;;  %v633_v47 = vstv %s2251_s10  ;;  %vm2755_vm5 = vcmask 891904   ;;  %s2309_s19 = sld [smem:[#allocation4 + $0x24]] }
  0xf0   : > { %v496_v38 = vadd.f32 %v495_v33, %v485_v34  ;;  %1058 = vrot.lane.b32.xlu0 %v1897_v1, %s2786_s26  ;;  %1068 = vrot.lane.b32.xlu1 %v1897_v1, %s2787_s12  ;;  %s2794_s26 = smov 113   ;;  %s2287_s12 = sld [smem:[#allocation4 + $0x21]] }
  0xf1   : > { %1078 = vrot.lane.b32.xlu2 %v1897_v1, %s2788_s20  ;;  %v557_v1 = vsel %vm2743_vm2, %v2118_v48, %v555_v40  ;;  %vm2746_vm2 = vcmask 1039360   ;;  %v610_v40 = vsel %vm2037_vm7, %v608_v35, 0.0  ;;  %s2301_s20 = sld [smem:[#allocation4 + $0x23]] }
  0xf2   : > { %v507_v42 = vadd.f32 %v505_v20, %v496_v38  ;;  %v616_v45 = vpop.permute.xlu0 %615  ;;  %v2201_v19 = vpop.permute.xlu1 %626  ;;  %v559_v48 = vsel %vm1938_vm10, %v557_v1, 0.0  ;;  %v586_v12 = vsel %vm2746_vm2, %v2155_v15, %v584_v63  ;;  %v589_v15 = vstv %s2215_s7  ;;  %s2795_s7 = smov 111   ;;  %s2344_s10 = sld [smem:[#allocation4 + $0x27]] }
  0xf3   : > { %v2206_v9 = vpop.permute.xlu2 %728  ;;  %v561_v8 = vmul.f32 %v560_v2, %v559_v48  ;;  %v617_v32 = vrot.slane %v616_v45, 1  ;;  %v588_v33 = vsel %vm1985_vm4, %v586_v12, 0.0  ;;  %vm2749_vm2 = vcmask 941056  }
  0xf4   : > { %v518_v60 = vadd.f32 %v517_v11, %v507_v42  ;;  %v628_v36 = vrot.slane %v2201_v19, 1  ;;  %v590_v39 = vmul.f32 %v589_v15, %v588_v33  ;;  %v1155_v20 = vstv %s2236_s8  ;;  %s2324_s8 = sld [smem:[#allocation4 + $0x25]] }
  0xf5   : > { %v619_v3 = vsel %vm2749_vm2, %v616_v45, %v617_v32  ;;  %v622_v45 = vstv %s2245_s6  ;;  %v612_v55 = vmul.f32 %v611_v49, %v610_v40  ;;  %vm2753_vm2 = vcmask 908288   ;;  %s2799_s6 = smov 99  }
  0xf6   : > { %v529_v59 = vadd.f32 %v528_v54, %v518_v60  ;;  %v630_v11 = vsel %vm2751_vm14, %v2201_v19, %v628_v36  ;;  %v621_v51 = vsel %vm1947_vm13, %v619_v3, 0.0  ;;  %v1156_v19 = vmul.f32 %v1155_v20, %v2217_v58 }
  0xf7   : > { %v632_v57 = vsel %vm1938_vm10, %v630_v11, 0.0  ;;  %v623_v63 = vmul.f32 %v622_v45, %v621_v51  ;;  %v643_v2 = vsel %vm1979_vm3, %v641_v52, 0.0  ;;  %vm2759_vm14 = vcmask 916480  }
  0xf8   : > { %v540_v4 = vadd.f32 %v539_v61, %v529_v59  ;;  %1095 = vrot.lane.b32.xlu0 %v2217_v58, %s2789_s23  ;;  %1105 = vrot.lane.b32.xlu1 %v2217_v58, %s2790_s5  ;;  %v644_v59 = vstv %s2256_s11  ;;  %v672_v61 = vrot.slane %v2127_v53, 1  ;;  %s2797_s23 = smov 110   ;;  %s2316_s5 = sld [smem:[#allocation4 + $0x57]]  ;;  %v677_v10 = vstv %s2287_s12 }
  0xf9   : > { %1115 = vrot.lane.b32.xlu2 %v2217_v58, %s2791_s24  ;;  %v645_v7 = vmul.f32 %v644_v59, %v643_v2  ;;  %v699_v3 = vstv %s2301_s20  ;;  %s2798_s24 = smov 109   ;;  %v710_v49 = vstv %s2309_s19  ;;  %s2800_s11 = smov 98  }
  0xfa   : > { %v551_v46 = vadd.f32 %v550_v6, %v540_v4  ;;  %v660_v14 = vpop.permute.xlu0 %659  ;;  %v2243_v18 = vpop.permute.xlu1 %651  ;;  %v634_v6 = vmul.f32 %v633_v47, %v632_v57  ;;  %v674_v56 = vsel %vm2754_vm8, %v2127_v53, %v672_v61  ;;  %vm2757_vm8 = vcmask 809984   ;;  %s2373_s12 = sld [smem:[#allocation4 + $0x2b]] }
  0xfb   : > { %v2247_v28 = vpop.permute.xlu2 %769  ;;  %v661_v60 = vrot.slane %v660_v14, 1  ;;  %v653_v62 = vrot.slane %v2243_v18, 1  ;;  %v676_v32 = vsel %vm2024_vm0, %v674_v56, 0.0  ;;  %v730_v61 = vrot.slane %v2206_v9, 1  ;;  %s2395_s20 = sld [smem:[#allocation4 + $0x2e]] }
  0xfc   : > { %v562_v29 = vadd.f32 %v561_v8, %v551_v46  ;;  %v705_v46 = vrot.slane %v2164_v25, 1  ;;  %s2408_s19 = sld [smem:[#allocation4 + $0x5e]] }
  0xfd   : > { %v663_v48 = vsel %vm2753_vm2, %v660_v14, %v661_v60  ;;  %vm2756_vm2 = vcmask 801792   ;;  %v655_v33 = vsel %vm2759_vm14, %v2243_v18, %v653_v62  ;;  %v721_v60 = vstv %s2324_s8  ;;  %s2428_s8 = sld [smem:[#allocation4 + $0x32]] }
  0xfe   : > { %v573_v34 = vadd.f32 %v572_v24, %v562_v29  ;;  %v665_v12 = vsel %vm1985_vm4, %v663_v48, 0.0  ;;  %v707_v35 = vsel %vm2756_vm2, %v2164_v25, %v705_v46  ;;  %vm2760_vm2 = vcmask 777216  }
  0xff   : > { %v667_v15 = vmul.f32 %v666_v26, %v665_v12  ;;  %v709_v40 = vsel %vm1938_vm10, %v707_v35, 0.0  ;;  %vm2762_vm14 = vcmask 760832  }
 0x100   : > { %v578_v38 = vadd.f32 %v577_v31, %v573_v34  ;;  %1125 = vrot.lane.b32.xlu0 %v2217_v58, %s2792_s9  ;;  %1135 = vrot.lane.b32.xlu1 %v2217_v58, %s2793_s13  ;;  %v688_v34 = vstv %s2295_s17  ;;  %s2357_s9 = sld [smem:[#allocation4 + $0x29]]  ;;  %s2802_s17 = smov 96  }
 0x101   : > { %1145 = vrot.lane.b32.xlu2 %v2217_v58, %s2794_s26  ;;  %s2362_s13 = sld [smem:[#allocation4 + $0x2a]]  ;;  %s2801_s26 = smov 95  }
 0x102   : > { %v591_v41 = vadd.f32 %v590_v39, %v578_v38  ;;  %v682_v42 = vpop.permute.xlu0 %681  ;;  %v693_v43 = vpop.permute.xlu1 %692  ;;  %v678_v39 = vmul.f32 %v677_v10, %v676_v32 }
 0x103   : > { %v2285_v54 = vpop.permute.xlu2 %813  ;;  %v683_v5 = vrot.slane %v682_v42, 1  ;;  %v694_v21 = vrot.slane %v693_v43, 1 }
 0x104   : > { %v602_v1 = vadd.f32 %v601_v22, %v591_v41 }
 0x105   : > { %v685_v53 = vsel %vm2755_vm5, %v682_v42, %v683_v5  ;;  %v696_v17 = vsel %vm2757_vm8, %v693_v43, %v694_v21  ;;  %vm2758_vm5 = vcmask 793600   ;;  %v1225_v43 = vstv %s2316_s5  ;;  %s2422_s5 = sld [smem:[#allocation4 + $0x31]] }
 0x106   : > { %v613_v23 = vadd.f32 %v612_v55, %v602_v1  ;;  %v687_v0 = vsel %vm2037_vm7, %v685_v53, 0.0  ;;  %v698_v25 = vsel %vm1947_vm13, %v696_v17, 0.0  ;;  %v711_v55 = vmul.f32 %v710_v49, %v709_v40 }
 0x107   : > { %v689_v18 = vmul.f32 %v688_v34, %v687_v0  ;;  %v700_v52 = vmul.f32 %v699_v3, %v698_v25  ;;  %vm2761_vm8 = vcmask 769024   ;;  %v1226_v47 = vmul.f32 %v1225_v43, %v2217_v58 }
 0x108   : > { %v624_v4 = vadd.f32 %v623_v63, %v613_v23  ;;  %1165 = vrot.lane.b32.xlu0 %v2217_v58, %s2795_s7  ;;  %1158 = vrot.lane.b32.xlu1 %v1156_v19, %s2796_s29  ;;  %v771_v5 = vrot.slane %v2247_v28, 1  ;;  %v765_v10 = vstv %s2357_s9  ;;  %v776_v35 = vstv %s2362_s13  ;;  %s2803_s7 = smov 94   ;;  %s2403_s29 = sld [smem:[#allocation4 + $0x2f]] }
 0x109   : > { %1175 = vrot.lane.b32.xlu2 %v2217_v58, %s2797_s23  ;;  %s2804_s23 = smov 83   ;;  %s1517_s9 = sld [smem:[#allocation4 + $0x3c]] }
 0x10a   : > { %v635_v8 = vadd.f32 %v634_v6, %v624_v4  ;;  %v715_v14 = vpop.permute.xlu0 %714  ;;  %v737_v24 = vpop.permute.xlu1 %736  ;;  %v743_v4 = vstv %s2344_s10  ;;  %s2440_s10 = sld [smem:[#allocation4 + $0x33]] }
 0x10b   : > { %v2319_v29 = vpop.permute.xlu2 %835  ;;  %v716_v37 = vrot.slane %v715_v14, 1  ;;  %v738_v22 = vrot.slane %v737_v24, 1  ;;  %s2499_s13 = sld [smem:[#allocation4 + $0x3d]] }
 0x10c   : > { %v646_v31 = vadd.f32 %v645_v7, %v635_v8  ;;  %v754_v8 = vstv %s2350_s30  ;;  %s1515_s30 = sld [smem:[#allocation4 + $0x3a]] }
 0x10d   : > { %v718_v41 = vsel %vm2758_vm5, %v715_v14, %v716_v37  ;;  %v740_v59 = vsel %vm2760_vm2, %v737_v24, %v738_v22  ;;  %vm2766_vm5 = vcmask 785408   ;;  %vm2765_vm2 = vcmask 678912  }
 0x10e   : > { %v657_v36 = vadd.f32 %v655_v33, %v646_v31  ;;  %v720_v19 = vsel %vm1979_vm3, %v718_v41, 0.0  ;;  %v742_v6 = vsel %vm1985_vm4, %v740_v59, 0.0  ;;  %v732_v7 = vsel %vm2766_vm5, %v2206_v9, %v730_v61 }
 0x10f   : > { %v722_v2 = vmul.f32 %v721_v60, %v720_v19  ;;  %v744_v24 = vmul.f32 %v743_v4, %v742_v6  ;;  %v773_v9 = vsel %vm2765_vm2, %v2247_v28, %v771_v5  ;;  %v815_v37 = vrot.slane %v2285_v54, 1 }
 0x110   : > { %v668_v38 = vadd.f32 %v667_v15, %v657_v36  ;;  %1185 = vrot.lane.b32.xlu0 %v2217_v58, %s2798_s24  ;;  %1195 = vrot.lane.b32.xlu1 %v2217_v58, %s2799_s6  ;;  %v775_v36 = vsel %vm1947_vm13, %v773_v9, 0.0  ;;  %vm838_vm2 = vcmask 629760   ;;  %vm808_vm5 = vcmask 654336   ;;  %s2805_s24 = smov 82   ;;  %s2806_s6 = smov 81  }
 0x111   : > { %1205 = vrot.lane.b32.xlu2 %v2217_v58, %s2800_s11  ;;  %v820_v19 = vstv %s2395_s20  ;;  %v831_v61 = vstv %s2403_s29  ;;  %s1511_s11 = sld [smem:[#allocation4 + $0x36]] }
 0x112   : > { %v679_v20 = vadd.f32 %v678_v39, %v668_v38  ;;  %v748_v11 = vpop.permute.xlu0 %747  ;;  %v759_v42 = vpop.permute.xlu1 %758  ;;  %v787_v38 = vstv %s2373_s12  ;;  %s2510_s12 = sld [smem:[#allocation4 + $0x3f]] }
 0x113   : > { %v2352_v45 = vpop.permute.xlu2 %868  ;;  %v749_v1 = vrot.slane %v748_v11, 1  ;;  %v760_v23 = vrot.slane %v759_v42, 1  ;;  %s2529_s20 = sld [smem:[#allocation4 + $0x43]] }
 0x114   : > { %v690_v51 = vadd.f32 %v689_v18, %v679_v20  ;;  %v777_v18 = vmul.f32 %v776_v35, %v775_v36  ;;  %v870_v4 = vrot.slane %v2352_v45, 1  ;;  %v874_v36 = vstv %s2440_s10  ;;  %s1526_s29 = sld [smem:[#allocation4 + $0x45]] }
 0x115   : > { %v751_v48 = vsel %vm2761_vm8, %v748_v11, %v749_v1  ;;  %v762_v62 = vsel %vm2762_vm14, %v759_v42, %v760_v23  ;;  %vm2763_vm8 = vcmask 670720   ;;  %vm2764_vm14 = vcmask 662528   ;;  %s2588_s10 = sld [smem:[#allocation4 + $0x4d]] }
 0x116   : > { %v701_v57 = vadd.f32 %v700_v52, %v690_v51  ;;  %v753_v12 = vsel %vm2024_vm0, %v751_v48, 0.0  ;;  %v764_v32 = vsel %vm2037_vm7, %v762_v62, 0.0  ;;  %v837_v51 = vrot.slane %v2319_v29, 1 }
 0x117   : > { %v755_v33 = vmul.f32 %v754_v8, %v753_v12  ;;  %v766_v28 = vmul.f32 %v765_v10, %v764_v32  ;;  %v854_v12 = vstv %s2422_s5  ;;  %v871_v32 = vsel %vm336_vm12, %v2352_v45, %v870_v4  ;;  %s1530_s5 = sld [smem:[#allocation4 + $0x49]] }
 0x118   : > { %v712_v63 = vadd.f32 %v711_v55, %v701_v57  ;;  %1215 = vrot.lane.b32.xlu0 %v2217_v58, %s1728_s18  ;;  %1235 = vrot.lane.b32.xlu1 %v2217_v58, %s2801_s26  ;;  %s2382_s18 = sld [smem:[#allocation4 + $0x2c]]  ;;  %v839_v57 = vsel %vm838_vm2, %v2319_v29, %v837_v51  ;;  %vm2810_vm12 = vcmask 277504  }
 0x119   : > { %1228 = vrot.lane.b32.xlu2 %v1226_v47, %s2802_s17  ;;  %s1519_s26 = sld [smem:[#allocation4 + $0x3e]] }
 0x11a   : > { %v723_v26 = vadd.f32 %v722_v2, %v712_v63  ;;  %v781_v56 = vpop.permute.xlu0 %780  ;;  %v792_v46 = vpop.permute.xlu1 %791  ;;  %v1295_v63 = vstv %s2408_s19  ;;  %s2514_s17 = sld [smem:[#allocation4 + $0x40]] }
 0x11b   : > { %v782_v21 = vrot.slane %v781_v56, 1  ;;  %v2384_v14 = vpop.permute.xlu2 %898  ;;  %v793_v31 = vrot.slane %v792_v46, 1  ;;  %s2550_s19 = sld [smem:[#allocation4 + $0x46]] }
 0x11c   : > { %v734_v53 = vadd.f32 %v732_v7, %v723_v26  ;;  %v841_v26 = vsel %vm2037_vm7, %v839_v57, 0.0 }
 0x11d   : > { %v784_v34 = vsel %vm2763_vm8, %v781_v56, %v782_v21  ;;  %v795_v17 = vsel %vm2764_vm14, %v792_v46, %v793_v31  ;;  %vm816_vm8 = vcmask 646144   ;;  %vm827_vm14 = vcmask 637952  }
 0x11e   : > { %v745_v15 = vadd.f32 %v744_v24, %v734_v53  ;;  %v786_v39 = vsel %vm1938_vm10, %v784_v34, 0.0  ;;  %v798_v40 = vstv %s2382_s18  ;;  %v797_v20 = vsel %vm1979_vm3, %v795_v17, 0.0  ;;  %s1522_s18 = sld [smem:[#allocation4 + $0x41]] }
 0x11f   : > { %v788_v42 = vmul.f32 %v787_v38, %v786_v39  ;;  %v817_v43 = vsel %vm816_vm8, %v2285_v54, %v815_v37  ;;  %v799_v1 = vmul.f32 %v798_v40, %v797_v20  ;;  %v1296_v21 = vmul.f32 %v1295_v63, %v2217_v58 }
 0x120   : > { %v756_v0 = vadd.f32 %v755_v33, %v745_v15  ;;  %1245 = vrot.lane.b32.xlu0 %v2217_v58, %s2803_s7  ;;  %1255 = vrot.lane.b32.xlu1 %v2217_v58, %s1732_s22  ;;  %s2415_s22 = sld [smem:[#allocation4 + $0x30]]  ;;  %v819_v47 = vsel %vm1985_vm4, %v817_v43, 0.0  ;;  %v864_v33 = vstv %s2428_s8 }
 0x121   : > { %1265 = vrot.lane.b32.xlu2 %v2217_v58, %s2804_s23  ;;  %v821_v29 = vmul.f32 %v820_v19, %v819_v47  ;;  %s2533_s7 = sld [smem:[#allocation4 + $0x44]] }
 0x122   : > { %v767_v3 = vadd.f32 %v766_v28, %v756_v0  ;;  %v806_v25 = vpop.permute.xlu0 %805  ;;  %v825_v49 = vpop.permute.xlu1 %824  ;;  %v873_v0 = vsel %vm1979_vm3, %v871_v32, 0.0  ;;  %s2554_s23 = sld [smem:[#allocation4 + $0x47]] }
 0x123   : > { %v826_v41 = vrot.slane %v825_v49, 1  ;;  %v2417_v22 = vpop.permute.xlu2 %928  ;;  %v807_v52 = vrot.slane %v806_v25, 1  ;;  %s2570_s8 = sld [smem:[#allocation4 + $0x4a]] }
 0x124   : > { %v778_v11 = vadd.f32 %v777_v18, %v767_v3  ;;  %v900_v3 = vrot.slane %v2384_v14, 1  ;;  %v930_v57 = vrot.slane %v2417_v22, 1 }
 0x125   : > { %v828_v55 = vsel %vm827_vm14, %v825_v49, %v826_v41  ;;  %v809_v59 = vsel %vm808_vm5, %v806_v25, %v807_v52  ;;  %v875_v49 = vmul.f32 %v874_v36, %v873_v0  ;;  %v904_v52 = vstv %s1511_s11  ;;  %s2601_s11 = sld [smem:[#allocation4 + $0x4f]] }
 0x126   : > { %v789_v60 = vadd.f32 %v788_v42, %v778_v11  ;;  %v830_v23 = vsel %vm2024_vm0, %v828_v55, 0.0  ;;  %v842_v6 = vstv %s2415_s22  ;;  %v964_v0 = vstv %s1517_s9  ;;  %s2558_s22 = sld [smem:[#allocation4 + $0x48]] }
 0x127   : > { %v832_v8 = vmul.f32 %v831_v61, %v830_v23  ;;  %v843_v31 = vmul.f32 %v842_v6, %v841_v26  ;;  %v931_v6 = vsel %vm2810_vm12, %v2417_v22, %v930_v57  ;;  %vm2816_vm12 = vcmask 146432   ;;  %s1542_s9 = sld [smem:[#allocation4 + $0x55]] }
 0x128   : > { %v800_v54 = vadd.f32 %v799_v1, %v789_v60  ;;  %1275 = vrot.lane.b32.xlu0 %v2217_v58, %s2805_s24  ;;  %1285 = vrot.lane.b32.xlu1 %v2217_v58, %s2806_s6  ;;  %s2580_s24 = sld [smem:[#allocation4 + $0x4b]] }
 0x129   : > { %1305 = vrot.lane.b32.xlu2 %v2217_v58, %s1736_s27  ;;  %s2453_s27 = sld [smem:[#allocation4 + $0x35]] }
 0x12a   : > { %v811_v2 = vadd.f32 %v809_v59, %v800_v54  ;;  %v849_v48 = vpop.permute.xlu0 %848  ;;  %v859_v5 = vpop.permute.xlu1 %858  ;;  %s2584_s6 = sld [smem:[#allocation4 + $0x4c]] }
 0x12b   : > { %v850_v7 = vrot.slane %v849_v48, 1  ;;  %v860_v62 = vrot.slane %v859_v5, 1  ;;  %v2449_v56 = vpop.permute.xlu2 %951 }
 0x12c   : > { %v822_v46 = vadd.f32 %v821_v29, %v811_v2 }
 0x12d   : > { %v851_v24 = vsel %vm314_vm9, %v849_v48, %v850_v7  ;;  %v861_v53 = vsel %vm325_vm6, %v859_v5, %v860_v62  ;;  %vm2807_vm6 = vcmask 384000   ;;  %vm2808_vm9 = vcmask 375808  }
 0x12e   : > { %v833_v9 = vadd.f32 %v832_v8, %v822_v46  ;;  %v853_v10 = vsel %vm1947_vm13, %v851_v24, 0.0  ;;  %v863_v34 = vsel %vm1938_vm10, %v861_v53, 0.0  ;;  %v901_v43 = vsel %vm2808_vm9, %v2384_v14, %v900_v3 }
 0x12f   : > { %v855_v15 = vmul.f32 %v854_v12, %v853_v10  ;;  %v865_v28 = vmul.f32 %v864_v33, %v863_v34  ;;  %v894_v40 = vstv %s2453_s27  ;;  %v903_v60 = vsel %vm2024_vm0, %v901_v43, 0.0  ;;  %s2597_s27 = sld [smem:[#allocation4 + $0x4e]] }
 0x130   : > { %v844_v35 = vadd.f32 %v843_v31, %v833_v9  ;;  %1298 = vrot.lane.b32.xlu0 %v1296_v21, %s1737_s25  ;;  %1315 = vrot.lane.b32.xlu1 %v2217_v58, %s1738_s14  ;;  %s1512_s25 = sld [smem:[#allocation4 + $0x37]]  ;;  %v905_v23 = vmul.f32 %v904_v52, %v903_v60  ;;  %v933_v46 = vsel %vm1938_vm10, %v931_v6, 0.0  ;;  %v944_v31 = vstv %s1515_s30 }
 0x131   : > { %1325 = vrot.lane.b32.xlu2 %v2217_v58, %s1739_s21  ;;  %s1513_s14 = sld [smem:[#allocation4 + $0x38]]  ;;  %vm2814_vm9 = vcmask 236544  }
 0x132   : > { %v856_v45 = vadd.f32 %v855_v15, %v844_v35  ;;  %v889_v17 = vpop.permute.xlu0 %888  ;;  %v882_v37 = vpop.permute.xlu1 %881  ;;  %s1514_s21 = sld [smem:[#allocation4 + $0x39]]  ;;  %v953_v15 = vrot.slane %v2449_v56, 1 }
 0x133   : > { %v890_v38 = vrot.slane %v889_v17, 1  ;;  %v883_v39 = vrot.slane %v882_v37, 1  ;;  %v2473_v18 = vpop.permute.xlu2 %988  ;;  %s1541_s30 = sld [smem:[#allocation4 + $0x54]] }
 0x134   : > { %v866_v25 = vadd.f32 %v865_v28, %v856_v45 }
 0x135   : > { %v891_v20 = vsel %vm2807_vm6, %v889_v17, %v890_v38  ;;  %v884_v42 = vsel %vm350_vm1, %v882_v37, %v883_v39  ;;  %vm2809_vm1 = vcmask 285696   ;;  %vm2812_vm6 = vcmask 261120  }
 0x136   : > { %v893_v58 = vsel %vm1985_vm4, %v891_v20, 0.0  ;;  %v876_v41 = vadd.f32 %v875_v49, %v866_v25  ;;  %v914_v61 = vstv %s1512_s25  ;;  %v954_v28 = vsel %vm2812_vm6, %v2449_v56, %v953_v15  ;;  %s2608_s25 = sld [smem:[#allocation4 + $0x51]] }
 0x137   : > { %v895_v11 = vmul.f32 %v894_v40, %v893_v58  ;;  %v924_v2 = vstv %s1513_s14  ;;  %v990_v25 = vrot.slane %v2473_v18, 1  ;;  %v974_v49 = vstv %s2499_s13  ;;  %s1539_s14 = sld [smem:[#allocation4 + $0x52]] }
 0x138   : > { %v886_v51 = vadd.f32 %v884_v42, %v876_v41  ;;  %v934_v62 = vstv %s1514_s21  ;;  %vm2818_vm6 = vcmask 121856   ;;  %v1044_v15 = vstv %s2533_s7  ;;  %s1540_s21 = sld [smem:[#allocation4 + $0x53]] }
 0x139   : > { %v935_v10 = vmul.f32 %v934_v62, %v933_v46  ;;  %s1543_s13 = sld [smem:[#allocation4 + $0x56]] }
 0x13a   : > { %v909_v1 = vpop.permute.xlu0 %908  ;;  %v919_v55 = vpop.permute.xlu1 %918  ;;  %v896_v19 = vadd.f32 %v895_v11, %v886_v51  ;;  %v984_v11 = vstv %s1519_s26  ;;  %s1545_s26 = sld [smem:[#allocation4 + $0x58]] }
 0x13b   : > { %v910_v47 = vrot.slane %v909_v1, 1  ;;  %v920_v54 = vrot.slane %v919_v55, 1  ;;  %v2485_v59 = vpop.permute.xlu2 %1028  ;;  %s1550_s7 = sld [smem:[#allocation4 + $0x5d]] }
 0x13c   : > { %v906_v5 = vadd.f32 %v905_v23, %v896_v19 }
 0x13d   : > { %v911_v14 = vsel %vm380_vm15, %v909_v1, %v910_v47  ;;  %v921_v63 = vsel %vm2809_vm1, %v919_v55, %v920_v54  ;;  %vm2811_vm15 = vcmask 269312   ;;  %vm2815_vm1 = vcmask 154624  }
 0x13e   : > { %v913_v29 = vsel %vm2037_vm7, %v911_v14, 0.0  ;;  %v923_v48 = vsel %vm1947_vm13, %v921_v63, 0.0  ;;  %v991_v52 = vsel %vm2815_vm1, %v2473_v18, %v990_v25  ;;  %v994_v55 = vstv %s2510_s12  ;;  %s2639_s12 = sld [smem:[#allocation4 + $0x59]] }
 0x13f   : > { %v915_v4 = vmul.f32 %v914_v61, %v913_v29  ;;  %v925_v7 = vmul.f32 %v924_v2, %v923_v48  ;;  %v993_v19 = vsel %vm1947_vm13, %v991_v52, 0.0  ;;  %v1030_v14 = vrot.slane %v2485_v59, 1 }
 0x140   : > { %v1004_v63 = vstv %s2514_s17  ;;  %v995_v18 = vmul.f32 %v994_v55, %v993_v19  ;;  %vm2821_vm1 = vcmask 105472   ;;  %v1088_v19 = vld [vmem:[#allocation3 + $0x1] sm:$0x3]  ;;  %s1547_s17 = sld [smem:[#allocation4 + $0x5a]] }
 0x141   : > { %v916_v26 = vadd.f32 %v915_v4, %v906_v5  ;;  %v1014_v5 = vstv %s1522_s18  ;;  %s2648_s18 = sld [smem:[#allocation4 + $0x5b]] }
 0x142   : > { %v939_v8 = vpop.permute.xlu0 %938  ;;  %v959_v12 = vpop.permute.xlu1 %958 }
 0x143   : > { %v926_v21 = vadd.f32 %v925_v7, %v916_v26  ;;  %v940_v24 = vrot.slane %v939_v8, 1  ;;  %v960_v53 = vrot.slane %v959_v12, 1  ;;  %v2497_v9 = vpop.permute.xlu2 %1048  ;;  %v1031_v7 = vsel %vm2818_vm6, %v2485_v59, %v1030_v14 }
 0x144   : > { %vm2824_vm6 = vcmask 15360  }
 0x145   : > { %v941_v22 = vsel %vm2811_vm15, %v939_v8, %v940_v24  ;;  %v936_v33 = vadd.f32 %v935_v10, %v926_v21  ;;  %v961_v35 = vsel %vm435_vm11, %v959_v12, %v960_v53  ;;  %vm2813_vm11 = vcmask 244736  }
 0x146   : > { %v943_v32 = vsel %vm1979_vm3, %v941_v22, 0.0  ;;  %v963_v45 = vsel %vm1985_vm4, %v961_v35, 0.0  ;;  %vm2817_vm15 = vcmask 138240   ;;  %v1034_v12 = vstv %s2529_s20  ;;  %s2651_s20 = sld [smem:[#allocation4 + $0x5c]] }
 0x147   : > { %v945_v34 = vmul.f32 %v944_v31, %v943_v32  ;;  %v965_v40 = vmul.f32 %v964_v0, %v963_v45  ;;  %v1033_v21 = vsel %vm1985_vm4, %v1031_v7, 0.0  ;;  %v1050_v32 = vrot.slane %v2497_v9, 1 }
 0x149   : > { %v946_v36 = vadd.f32 %v945_v34, %v936_v33  ;;  %v1035_v34 = vmul.f32 %v1034_v12, %v1033_v21  ;;  %v1051_v45 = vsel %vm2821_vm1, %v2497_v9, %v1050_v32  ;;  %vm2827_vm1 = vcmask 1022976  }
 0x14a   : > { %v969_v17 = vpop.permute.xlu0 %968  ;;  %v979_v37 = vpop.permute.xlu1 %978  ;;  %v1121_v32 = vstv %s2584_s6 }
 0x14b   : > { %v956_v38 = vadd.f32 %v954_v28, %v946_v36  ;;  %v970_v39 = vrot.slane %v969_v17, 1  ;;  %v980_v3 = vrot.slane %v979_v37, 1  ;;  %v2518_v41 = vpop.permute.xlu2 %1078 }
 0x14d   : > { %v971_v20 = vsel %vm2813_vm11, %v969_v17, %v970_v39  ;;  %v981_v58 = vsel %vm2814_vm9, %v979_v37, %v980_v3  ;;  %v966_v43 = vadd.f32 %v965_v40, %v956_v38  ;;  %vm2819_vm11 = vcmask 130048  }
 0x14e   : > { %v973_v56 = vsel %vm2024_vm0, %v971_v20, 0.0  ;;  %v983_v42 = vsel %vm2037_vm7, %v981_v58, 0.0  ;;  %vm2820_vm9 = vcmask 113664   ;;  %v1080_v17 = vrot.slane %v2518_v41, 1 }
 0x14f   : > { %v975_v51 = vmul.f32 %v974_v49, %v973_v56  ;;  %v985_v1 = vmul.f32 %v984_v11, %v983_v42  ;;  %v1054_v38 = vstv %s1526_s29  ;;  %v1053_v39 = vsel %vm2037_vm7, %v1051_v45, 0.0  ;;  %s2663_s29 = sld [smem:[#allocation4 + $0x5f]] }
 0x150   : > { %v1064_v58 = vstv %s2550_s19  ;;  %v1055_v56 = vmul.f32 %v1054_v38, %v1053_v39  ;;  %s2666_s19 = sld [smem:[#allocation4 + $0x60]] }
 0x151   : > { %v976_v60 = vadd.f32 %v975_v51, %v966_v43  ;;  %v1074_v51 = vstv %s2554_s23  ;;  %s1554_s23 = sld [smem:[#allocation4 + $0x61]] }
 0x152   : > { %v999_v47 = vpop.permute.xlu0 %998  ;;  %v1009_v54 = vpop.permute.xlu1 %1008 }
 0x153   : > { %v986_v57 = vadd.f32 %v985_v1, %v976_v60  ;;  %v1000_v61 = vrot.slane %v999_v47, 1  ;;  %v1010_v23 = vrot.slane %v1009_v54, 1  ;;  %v2543_v62 = vpop.permute.xlu2 %1115  ;;  %v1084_v60 = vstv %s2558_s22  ;;  %s1334_s22 = sld [smem:[#allocation6]] }
 0x155   : > { %v1001_v29 = vsel %vm2816_vm12, %v999_v47, %v1000_v61  ;;  %v1011_v2 = vsel %vm2817_vm15, %v1009_v54, %v1010_v23  ;;  %v996_v6 = vadd.f32 %v995_v18, %v986_v57  ;;  %vm2822_vm12 = vcmask 7168  }
 0x156   : > { %v1003_v48 = vsel %vm1938_vm10, %v1001_v29, 0.0  ;;  %v1013_v4 = vsel %vm1979_vm3, %v1011_v2, 0.0  ;;  %v1081_v9 = vsel %vm2822_vm12, %v2518_v41, %v1080_v17  ;;  %vm2823_vm15 = vcmask 23552  }
 0x157   : > { %v1005_v26 = vmul.f32 %v1004_v63, %v1003_v48  ;;  %v1015_v8 = vmul.f32 %v1014_v5, %v1013_v4  ;;  %v1083_v41 = vsel %vm1979_vm3, %v1081_v9, 0.0  ;;  %v1089_v47 = vstv %s1530_s5  ;;  %s1555_s5 = sld [smem:[#allocation6 + $0x1]] }
 0x158   : > { %v1085_v61 = vmul.f32 %v1084_v60, %v1083_v41  ;;  %v1090_v23 = vmul.f32 %v1089_v47, %v1088_v19  ;;  %v1117_v48 = vrot.slane %v2543_v62, 1  ;;  %v1101_v4 = vstv %s2570_s8  ;;  %s2845_s8 = sshll.u32 %s2848_s16, 3 }
 0x159   : > { %v1006_v46 = vadd.f32 %v1005_v26, %v996_v6  ;;  %vm2828_vm12 = vcmask 941056   ;;  %v1321_v27 = vstv %s2666_s19  ;;  %v1331_v30 = vstv %s1554_s23 }
 0x15a   : > { %v1022_v24 = vpop.permute.xlu0 %1021  ;;  %v1039_v53 = vpop.permute.xlu1 %1038 }
 0x15b   : > { %v1016_v31 = vadd.f32 %v1015_v8, %v1006_v46  ;;  %v1023_v10 = vrot.slane %v1022_v24, 1  ;;  %v1040_v22 = vrot.slane %v1039_v53, 1  ;;  %v2563_v37 = vpop.permute.xlu2 %1145  ;;  %v1111_v8 = vstv %s2580_s24 }
 0x15d   : > { %v1024_v59 = vsel %vm2819_vm11, %v1022_v24, %v1023_v10  ;;  %v1041_v33 = vsel %vm2820_vm9, %v1039_v53, %v1040_v22  ;;  %vm2825_vm11 = vcmask 1039360   ;;  %vm2826_vm9 = vcmask 1031168  }
 0x15e   : > { %v1026_v35 = vadd.f32 %v1024_v59, %v1016_v31  ;;  %v1043_v36 = vsel %vm2024_vm0, %v1041_v33, 0.0  ;;  %v1118_v53 = vsel %vm2827_vm1, %v2543_v62, %v1117_v48  ;;  %v1147_v22 = vrot.slane %v2563_v37, 1 }
 0x15f   : > { %v1045_v0 = vmul.f32 %v1044_v15, %v1043_v36  ;;  %v1120_v15 = vsel %vm2037_vm7, %v1118_v53, 0.0  ;;  %vm2833_vm1 = vcmask 916480  }
 0x160   : > { %v1036_v28 = vadd.f32 %v1035_v34, %v1026_v35  ;;  %v1122_v62 = vmul.f32 %v1121_v32, %v1120_v15  ;;  %v1211_v15 = vstv %s1542_s9 }
 0x162   : > { %v1059_v3 = vpop.permute.xlu0 %1058  ;;  %v1069_v25 = vpop.permute.xlu1 %1068  ;;  %v1046_v49 = vadd.f32 %v1045_v0, %v1036_v28  ;;  %v1131_v0 = vstv %s2588_s10  ;;  %s224_s10 = scalar_lea.vmem %s2700_s4, %s2845_s8 }
 0x163   : > { %v1060_v40 = vrot.slane %v1059_v3, 1  ;;  %v1070_v20 = vrot.slane %v1069_v25, 1  ;;  %v1176_v5 = vpop.permute.xlu2 %1175 }
 0x164   : > { %v1056_v1 = vadd.f32 %v1055_v56, %v1046_v49  ;;  %v1177_v9 = vrot.slane %v1176_v5, 1 }
 0x165   : > { %v1061_v11 = vsel %vm2823_vm15, %v1059_v3, %v1060_v40  ;;  %v1071_v42 = vsel %vm2824_vm6, %v1069_v25, %v1070_v20  ;;  %vm2829_vm15 = vcmask 932864   ;;  %vm2830_vm6 = vcmask 924672  }
 0x166   : > { %v1063_v43 = vsel %vm1947_vm13, %v1061_v11, 0.0  ;;  %v1073_v52 = vsel %vm1938_vm10, %v1071_v42, 0.0  ;;  %v1148_v17 = vsel %vm2830_vm6, %v2563_v37, %v1147_v22  ;;  %v1141_v3 = vstv %s2597_s27 }
 0x167   : > { %v1065_v55 = vmul.f32 %v1064_v58, %v1063_v43  ;;  %v1075_v57 = vmul.f32 %v1074_v51, %v1073_v52  ;;  %v1151_v20 = vstv %s2601_s11  ;;  %v1150_v58 = vsel %vm1979_vm3, %v1148_v17, 0.0 }
 0x168   : > { %v1152_v51 = vmul.f32 %v1151_v20, %v1150_v58  ;;  %vm2836_vm6 = vcmask 801792  }
 0x169   : > { %v1066_v54 = vadd.f32 %v1065_v55, %v1056_v1  ;;  %v1171_v1 = vstv %s2608_s25 }
 0x16a   : > { %v1096_v14 = vpop.permute.xlu0 %1095  ;;  %v1106_v63 = vpop.permute.xlu1 %1105 }
 0x16b   : > { %v1076_v18 = vadd.f32 %v1075_v57, %v1066_v54  ;;  %v1097_v29 = vrot.slane %v1096_v14, 1  ;;  %v1107_v2 = vrot.slane %v1106_v63, 1  ;;  %v1206_v38 = vpop.permute.xlu2 %1205 }
 0x16d   : > { %v1086_v6 = vadd.f32 %v1085_v61, %v1076_v18  ;;  %v1098_v26 = vsel %vm2825_vm11, %v1096_v14, %v1097_v29  ;;  %v1108_v7 = vsel %vm2826_vm9, %v1106_v63, %v1107_v2  ;;  %vm2831_vm11 = vcmask 900096  }
 0x16e   : > { %v1100_v46 = vsel %vm1985_vm4, %v1098_v26, 0.0  ;;  %v1110_v12 = vsel %vm2024_vm0, %v1108_v7, 0.0  ;;  %v1178_v55 = vsel %vm2831_vm11, %v1176_v5, %v1177_v9  ;;  %vm2832_vm9 = vcmask 908288  }
 0x16f   : > { %v1091_v21 = vadd.f32 %v1090_v23, %v1086_v6  ;;  %v1102_v24 = vmul.f32 %v1101_v4, %v1100_v46  ;;  %v1112_v10 = vmul.f32 %v1111_v8, %v1110_v12  ;;  %v1181_v23 = vstv %s1539_s14 }
 0x170   : > { %v1180_v14 = vsel %vm2024_vm0, %v1178_v55, 0.0  ;;  %v1207_v6 = vrot.slane %v1206_v38, 1  ;;  %v1191_v26 = vstv %s1540_s21  ;;  %v1201_v12 = vstv %s1541_s30 }
 0x171   : > { %v1103_v31 = vadd.f32 %v1102_v24, %v1091_v21  ;;  %v1182_v18 = vmul.f32 %v1181_v23, %v1180_v14  ;;  %vm2837_vm11 = vcmask 793600  }
 0x172   : > { %v1126_v59 = vpop.permute.xlu0 %1125  ;;  %v1136_v33 = vpop.permute.xlu1 %1135 }
 0x173   : > { %v1113_v34 = vadd.f32 %v1112_v10, %v1103_v31  ;;  %v1127_v35 = vrot.slane %v1126_v59, 1  ;;  %v1137_v36 = vrot.slane %v1136_v33, 1  ;;  %v1229_v63 = vpop.permute.xlu2 %1228  ;;  %v1208_v31 = vsel %vm2836_vm6, %v1206_v38, %v1207_v6 }
 0x174   : > { %v1230_v38 = vrot.slane %v1229_v63, 1  ;;  %vm2842_vm6 = vcmask 678912   ;;  %v1281_v6 = vstv %s2651_s20 }
 0x175   : > { %v1128_v45 = vsel %vm2828_vm12, %v1126_v59, %v1127_v35  ;;  %v1138_v28 = vsel %vm2829_vm15, %v1136_v33, %v1137_v36  ;;  %v1123_v49 = vadd.f32 %v1122_v62, %v1113_v34  ;;  %vm2834_vm12 = vcmask 891904  }
 0x176   : > { %v1130_v39 = vsel %vm1947_vm13, %v1128_v45, 0.0  ;;  %v1140_v25 = vsel %vm1938_vm10, %v1138_v28, 0.0  ;;  %vm2835_vm15 = vcmask 809984   ;;  %v1210_v59 = vsel %vm1938_vm10, %v1208_v31, 0.0 }
 0x177   : > { %v1132_v40 = vmul.f32 %v1131_v0, %v1130_v39  ;;  %v1142_v11 = vmul.f32 %v1141_v3, %v1140_v25  ;;  %v1221_v62 = vstv %s1543_s13  ;;  %v1212_v45 = vmul.f32 %v1211_v15, %v1210_v59 }
 0x178   : > { %v1311_v59 = vstv %s2663_s29 }
 0x179   : > { %v1133_v56 = vadd.f32 %v1132_v40, %v1123_v49  ;;  %v1241_v40 = vstv %s1545_s26 }
 0x17a   : > { %v1166_v37 = vpop.permute.xlu0 %1165  ;;  %v1159_v42 = vpop.permute.xlu1 %1158 }
 0x17b   : > { %v1143_v43 = vadd.f32 %v1142_v11, %v1133_v56  ;;  %v1167_v52 = vrot.slane %v1166_v37, 1  ;;  %v1160_v60 = vrot.slane %v1159_v42, 1  ;;  %v1266_v32 = vpop.permute.xlu2 %1265 }
 0x17d   : > { %v1168_v41 = vsel %vm2832_vm9, %v1166_v37, %v1167_v52  ;;  %v1153_v19 = vadd.f32 %v1152_v51, %v1143_v43  ;;  %v1161_v47 = vsel %vm2833_vm1, %v1159_v42, %v1160_v60  ;;  %vm2838_vm9 = vcmask 777216  }
 0x17e   : > { %v1170_v54 = vsel %vm1985_vm4, %v1168_v41, 0.0  ;;  %vm2839_vm1 = vcmask 785408   ;;  %v1267_v43 = vrot.slane %v1266_v32, 1  ;;  %v1251_v52 = vstv %s2639_s12 }
 0x17f   : > { %v1172_v57 = vmul.f32 %v1171_v1, %v1170_v54  ;;  %v1163_v61 = vadd.f32 %v1161_v47, %v1153_v19  ;;  %v1231_v58 = vsel %vm2839_vm1, %v1229_v63, %v1230_v38  ;;  %v1261_v19 = vstv %s1547_s17 }
 0x180   : > { %v1271_v63 = vstv %s2648_s18 }
 0x181   : > { %v1173_v48 = vadd.f32 %v1172_v57, %v1163_v61  ;;  %v1268_v61 = vsel %vm2842_vm6, %v1266_v32, %v1267_v43 }
 0x182   : > { %v1186_v29 = vpop.permute.xlu0 %1185  ;;  %v1196_v2 = vpop.permute.xlu1 %1195 }
 0x183   : > { %v1187_v5 = vrot.slane %v1186_v29, 1  ;;  %v1197_v4 = vrot.slane %v1196_v2, 1  ;;  %v1183_v24 = vadd.f32 %v1182_v18, %v1173_v48  ;;  %v1306_v51 = vpop.permute.xlu2 %1305  ;;  %v1270_v18 = vsel %vm1947_vm13, %v1268_v61, 0.0  ;;  %v1359_v61 = vld [vmem:[%s1792_s28] sm:$0xff] }
 0x185   : > { %v1188_v7 = vsel %vm2834_vm12, %v1186_v29, %v1187_v5  ;;  %v1198_v46 = vsel %vm2835_vm15, %v1196_v2, %v1197_v4  ;;  %vm2840_vm12 = vcmask 769024   ;;  %vm2841_vm15 = vcmask 760832  }
 0x186   : > { %v1190_v8 = vsel %vm2037_vm7, %v1188_v7, 0.0  ;;  %v1200_v21 = vsel %vm1947_vm13, %v1198_v46, 0.0  ;;  %v1272_v7 = vmul.f32 %v1271_v63, %v1270_v18 }
 0x187   : > { %v1192_v53 = vmul.f32 %v1191_v26, %v1190_v8  ;;  %v1202_v22 = vmul.f32 %v1201_v12, %v1200_v21  ;;  %v1307_v26 = vrot.slane %v1306_v51, 1  ;;  %v1291_v21 = vstv %s1550_s7 }
 0x189   : > { %v1193_v10 = vadd.f32 %v1192_v53, %v1183_v24 }
 0x18a   : > { %v1216_v33 = vpop.permute.xlu0 %1215  ;;  %v1236_v34 = vpop.permute.xlu1 %1235 }
 0x18b   : > { %v1203_v35 = vadd.f32 %v1202_v22, %v1193_v10  ;;  %v1217_v36 = vrot.slane %v1216_v33, 1  ;;  %v1237_v0 = vrot.slane %v1236_v34, 1  ;;  %v1326_v12 = vpop.permute.xlu2 %1325  ;;  %v1308_v10 = vsel %vm816_vm8, %v1306_v51, %v1307_v26 }
 0x18c   : > { %v1327_v22 = vrot.slane %v1326_v12, 1  ;;  %v1310_v13 = vsel %vm1985_vm4, %v1308_v10, 0.0 }
 0x18d   : > { %v1218_v28 = vsel %vm2837_vm11, %v1216_v33, %v1217_v36  ;;  %v1213_v39 = vadd.f32 %v1212_v45, %v1203_v35  ;;  %v1238_v25 = vsel %vm2838_vm9, %v1236_v34, %v1237_v0  ;;  %vm2843_vm11 = vcmask 670720  }
 0x18e   : > { %v1220_v17 = vsel %vm1979_vm3, %v1218_v28, 0.0  ;;  %v1240_v20 = vsel %vm1985_vm4, %v1238_v25, 0.0  ;;  %vm2844_vm9 = vcmask 662528   ;;  %vm2846_vm4 = vcmask 1043456  }
 0x18f   : > { %v1222_v3 = vmul.f32 %v1221_v62, %v1220_v17  ;;  %v1242_v60 = vmul.f32 %v1241_v40, %v1240_v20  ;;  %v1328_v62 = vsel %vm838_vm2, %v1326_v12, %v1327_v22  ;;  %v1312_v17 = vmul.f32 %v1311_v59, %v1310_v13 }
 0x190   : > { %v1330_v25 = vsel %vm2037_vm7, %v1328_v62, 0.0 }
 0x191   : > { %v1223_v49 = vadd.f32 %v1222_v3, %v1213_v39  ;;  %v1332_v20 = vmul.f32 %v1331_v30, %v1330_v25 }
 0x192   : > { %v1246_v9 = vpop.permute.xlu0 %1245  ;;  %v1256_v56 = vpop.permute.xlu1 %1255 }
 0x193   : > { %v1233_v11 = vadd.f32 %v1231_v58, %v1223_v49  ;;  %v1247_v37 = vrot.slane %v1246_v9, 1  ;;  %v1257_v42 = vrot.slane %v1256_v56, 1  ;;  %v1335_v58 = vstv %s1334_s22 }
 0x195   : > { %v1248_v1 = vsel %vm2840_vm12, %v1246_v9, %v1247_v37  ;;  %v1258_v55 = vsel %vm2841_vm15, %v1256_v56, %v1257_v42  ;;  %v1243_v54 = vadd.f32 %v1242_v60, %v1233_v11  ;;  %v1338_v56 = vstv %s1555_s5 }
 0x196   : > { %v1250_v41 = vsel %vm2024_vm0, %v1248_v1, 0.0  ;;  %v1260_v47 = vsel %vm2037_vm7, %v1258_v55, 0.0 }
 0x197   : > { %v1252_v57 = vmul.f32 %v1251_v52, %v1250_v41  ;;  %v1262_v14 = vmul.f32 %v1261_v19, %v1260_v47 }
 0x199   : > { %v1253_v23 = vadd.f32 %v1252_v57, %v1243_v54 }
 0x19a   : > { %v1276_v29 = vpop.permute.xlu0 %1275  ;;  %v1286_v2 = vpop.permute.xlu1 %1285 }
 0x19b   : > { %v1263_v48 = vadd.f32 %v1262_v14, %v1253_v23  ;;  %v1277_v5 = vrot.slane %v1276_v29, 1  ;;  %v1287_v4 = vrot.slane %v1286_v2, 1 }
 0x19d   : > { %v1278_v46 = vsel %vm2843_vm11, %v1276_v29, %v1277_v5  ;;  %v1288_v8 = vsel %vm2844_vm9, %v1286_v2, %v1287_v4  ;;  %v1273_v53 = vadd.f32 %v1272_v7, %v1263_v48 }
 0x19e   : > { %v1280_v16 = vsel %vm1938_vm10, %v1278_v46, 0.0  ;;  %v1290_v24 = vsel %vm1979_vm3, %v1288_v8, 0.0 }
 0x19f   : > { %v1282_v31 = vmul.f32 %v1281_v6, %v1280_v16  ;;  %v1292_v15 = vmul.f32 %v1291_v21, %v1290_v24 }
 0x1a1   : > { %v1283_v32 = vadd.f32 %v1282_v31, %v1273_v53 }
 0x1a2   : > { %v1299_v33 = vpop.permute.xlu0 %1298  ;;  %v1316_v34 = vpop.permute.xlu1 %1315 }
 0x1a3   : > { %v1293_v35 = vadd.f32 %v1292_v15, %v1283_v32  ;;  %v1300_v36 = vrot.slane %v1299_v33, 1  ;;  %v1317_v0 = vrot.slane %v1316_v34, 1 }
 0x1a5   : > { %v1301_v45 = vsel %vm808_vm5, %v1299_v33, %v1300_v36  ;;  %v1318_v28 = vsel %vm827_vm14, %v1316_v34, %v1317_v0 }
 0x1a6   : > { %v1303_v38 = vadd.f32 %v1301_v45, %v1293_v35  ;;  %v1320_v39 = vsel %vm2024_vm0, %v1318_v28, 0.0 }
 0x1a7   : > { %v1322_v3 = vmul.f32 %v1321_v27, %v1320_v39 }
 0x1a8   : > { %v1313_v49 = vadd.f32 %v1312_v17, %v1303_v38 }
 0x1aa   : > { %v1323_v40 = vadd.f32 %v1322_v3, %v1313_v49 }
 0x1ac   : > { %v1333_v9 = vadd.f32 %v1332_v20, %v1323_v40 }
 0x1ae   : > { %v1336_v11 = vmul.f32 %v1335_v58, %v1333_v9 }
 0x1b0   : > { %v1339_v37 = vadd.f32 %v1338_v56, %v1336_v11 }
 0x1b2   : > { %v1556_v42 = vmul.f32 -1.442695, %v1339_v37 }
 0x1b4   : > { %1639 = vpow2.f32 %v1556_v42 }
 0x1ba   : > { %v1640_v43 = vpop.eup %1639 }
 0x1bb   : > { %v1343_v51 = vadd.f32 1.0, %v1640_v43 }
 0x1bd   : > { %1641 = vrcp.f32 %v1343_v51  ;;  %v1355_v50 = vand.u32 2147483648, %v1343_v51  ;;  %v1353_v55 = vand.u32 2147483647, %v1343_v51  ;;  %vm1349_vm13 = vweird.f32 %v1343_v51 }
 0x1bf   : > { %v1356_v19 = vor.u32 1.1754944e-38, %v1355_v50  ;;  %vm1354_vm3 = vcmp.eq.f32.partialorder %v1353_v55, 8.507059e+37 }
 0x1c3   : > { %v1642_v44 = vpop.eup %1641 }
 0x1c4   : > { %v1345_v52 = vmul.f32 %v1642_v44, %v1343_v51  ;;  %vm1350_vm10 = vweird.f32 %v1642_v44 }
 0x1c5   : > { %vm1351_vm2 = vmor %vm1349_vm13, %vm1350_vm10 }
 0x1c6   : > { %v1346_v60 = vsub.f32 1.0, %v1345_v52 }
 0x1c8   : > { %v1347_v1 = vmul.f32 %v1642_v44, %v1346_v60 }
 0x1ca   : > { %v1348_v41 = vadd.f32 %v1642_v44, %v1347_v1 }
 0x1cc   : > { %v1352_v47 = vsel %vm1351_vm2, %v1642_v44, %v1348_v41 }
 0x1cd   : > { %v1357_v54 = vsel %vm1354_vm3, %v1356_v19, %v1352_v47 }
 0x1ce   : > { %v1362_v57 = vperm.slane %v1357_v54, 1  ;;  %v1361_v23 = vperm.slane %v1357_v54, 0 }
 0x1d0   : > { %v1363_v14 = vrot.slane %v1362_v57, 4 }
 0x1d2   : > { %v1364_v63 = vsel %vm2846_vm4, %v1361_v23, %v1363_v14 }
 0x1d3   : > { %v1366_v18 = vmul.f32 %v1364_v63, %v1359_v61 }
 0x1d5   : > { %1367 = vst [vmem:[%s224_s10] sm:$0xff] %v1366_v18 }
 0x1d6 PF: > { %s16_s15 = sadd.s32 1, %s1687_s15  }
 0x1d7   : > { %p13_p7 = scmp.ge.s32.totalorder %s16_s15, 4  }
 0x1d9   :  { %15 = sbr.rel (!%p13_p7) target bundleno = 2 (0x2), region = 75 }
 0x1de   :  { %1389 = vsyncpa [#allocation5], 1 }
 0x1df   :  { %1391 = vsyncpa [#allocation5 + $0x1], 1 }
 0x1e0   :  { %1392 = vsyncpa [#allocation7], 1 }

</bundles_post_ra>
